<compile_context>
chip_gen: v5e
topology: v5e:2x2
jax: 0.10.0
libtpu: 0.0.40
codegen_flags: <defaults>
</compile_context>

<pallas_src>
import functools
import math

import jax
import jax.numpy as jnp
from jax.experimental import pallas as pl
from jax.experimental.pallas import tpu as pltpu

# ----------------------- model configuration (small) -----------------------
VOCAB = 100
MAX_POS = 16
HIDDEN = 32
HEADS = 2
HEAD_DIM = HIDDEN // HEADS
FF = 64
LAYERS = 2
LN_EPS = 1e-12


# ------------------------------ fused Pallas kernel ------------------------------
def _fused_bert_kernel(
    ids_ref, mask_ref,
    word_ref, pos_ref, type_ref,
    emb_g_ref, emb_b_ref,
    wqkv_ref, bqkv_ref, wo_ref, bo_ref,
    ln1g_ref, ln1b_ref, w1_ref, b1_ref, w2_ref, b2_ref,
    ln2g_ref, ln2b_ref,
    *rest, batch, seq, encoder_type):
    """Whole BERT forward (embeddings -> 2 layers -> pooling) in one program."""
    if encoder_type == "pooler":
        poolw_ref, poolb_ref, out_ref, ctx_ref = rest
    else:
        out_ref, ctx_ref = rest
        poolw_ref = poolb_ref = None

    tokens = batch * seq
    scale = 1.0 / math.sqrt(HEAD_DIM)

    def ln(t, g, b):
        mu = jnp.mean(t, axis=-1, keepdims=True)
        var = jnp.mean(jnp.square(t - mu), axis=-1, keepdims=True)
        return (t - mu) * jax.lax.rsqrt(var + LN_EPS) * g + b

    # ---------------- embeddings, fully in-kernel ----------------
    # word gather as one-hot(ids) @ word_emb on the MXU (no HBM round-trip)
    ids_col = ids_ref[...]                                           # (B*S, 1) int32
    vocab_iota = jax.lax.broadcasted_iota(jnp.int32, (tokens, VOCAB), 1)
    onehot = jnp.where(vocab_iota == ids_col, 1.0, 0.0)              # (B*S, VOCAB)
    word = jnp.dot(onehot, word_ref[...], preferred_element_type=jnp.float32)

    pos_block = pos_ref[0:seq, :]                                    # (S, H)
    pos_full = (jnp.concatenate([pos_block] * batch, axis=0)
                if batch > 1 else pos_block)                         # (B*S, H)
    # TODO(synk): token_type_ids assumed all-zero (type embedding row 0 only).
    x = ln(word + pos_full + type_ref[0:1, :], emb_g_ref[...], emb_b_ref[...])

    # additive attention mask, built once (hoisted out of all loops)
    neg = (1.0 - mask_ref[...].astype(jnp.float32)) * (-1e9)         # (B, S)
    mask3 = jnp.concatenate(
        [neg[b:b + 1, :][None, :, :]
         for b in range(batch) for _ in range(HEADS)], axis=0)       # (B*HEADS, 1, S)

    def split_heads(t):  # (B*S, H) -> (B*HEADS, S, DH), b-major then h
        return jnp.concatenate(
            [t[b * seq:(b + 1) * seq, h * HEAD_DIM:(h + 1) * HEAD_DIM][None, :, :]
             for b in range(batch) for h in range(HEADS)], axis=0)

    hidden_first = x
    for li in range(LAYERS):
        # ---- fused QKV projection: one (B*S, H) x (H, 3H) MXU matmul ----
        qkv = jnp.dot(x, wqkv_ref[li],
                      preferred_element_type=jnp.float32) + bqkv_ref[li]
        q4 = split_heads(qkv[:, 0:HIDDEN])
        k4 = split_heads(qkv[:, HIDDEN:2 * HIDDEN])
        v4 = split_heads(qkv[:, 2 * HIDDEN:3 * HIDDEN])

        # ---- batched attention over (batch*head): 2 MXU pushes per layer ----
        s = jnp.einsum('bqd,bkd->bqk', q4, k4,
                       preferred_element_type=jnp.float32)           # (BH, S, S)
        s = s * scale + mask3
        m = jnp.max(s, axis=-1, keepdims=True)
        p = jnp.exp(s - m)
        p = p / jnp.sum(p, axis=-1, keepdims=True)                   # exact divide
        ctx4 = jnp.einsum('bqk,bkd->bqd', p, v4,
                          preferred_element_type=jnp.float32)        # (BH, S, DH)

        # merge heads via static-slice stores into resident VMEM scratch
        for b in range(batch):
            for h in range(HEADS):
                ctx_ref[b * seq:(b + 1) * seq,
                        h * HEAD_DIM:(h + 1) * HEAD_DIM] = ctx4[b * HEADS + h]
        ctx = ctx_ref[...]                                           # (B*S, H)

        # ---- output projection + residual + LN1 ----
        attn_out = jnp.dot(ctx, wo_ref[li],
                           preferred_element_type=jnp.float32) + bo_ref[li]
        x1 = ln(x + attn_out, ln1g_ref[li], ln1b_ref[li])

        # ---- FFN + residual + LN2 ----
        hid = jnp.dot(x1, w1_ref[li],
                      preferred_element_type=jnp.float32) + b1_ref[li]
        # TODO(synk): HF BERT uses exact erf GELU; tanh approximation kept for
        # guaranteed Mosaic lowering.
        hid = jax.nn.gelu(hid, approximate=True)
        ffn = jnp.dot(hid, w2_ref[li],
                      preferred_element_type=jnp.float32) + b2_ref[li]
        x = ln(x1 + ffn, ln2g_ref[li], ln2b_ref[li])

        if li == 0:
            hidden_first = x                                         # hidden_states[1]

    # ---- pooling: direct per-batch-row stores into out_ref ----
    for b in range(batch):
        r0 = b * seq
        if encoder_type == "fist-last-avg":
            f = jnp.mean(hidden_first[r0:r0 + seq, :], axis=0, keepdims=True)
            l = jnp.mean(x[r0:r0 + seq, :], axis=0, keepdims=True)
            out_ref[b:b + 1, :] = 0.5 * (f + l)
        elif encoder_type == "last-avg":
            out_ref[b:b + 1, :] = jnp.mean(x[r0:r0 + seq, :], axis=0, keepdims=True)
        elif encoder_type == "cls":
            out_ref[b:b + 1, :] = x[r0:r0 + 1, :]
        elif encoder_type == "pooler":
            cls = x[r0:r0 + 1, :]
            out_ref[b:b + 1, :] = jnp.tanh(
                jnp.dot(cls, poolw_ref[...],
                        preferred_element_type=jnp.float32) + poolb_ref[...])
        else:
            raise NotImplementedError(encoder_type)


# --------------------------- parameter construction ---------------------------
def init_params(key):
    def nrm(k, shape, scale=0.02):
        return scale * jax.random.normal(k, shape, dtype=jnp.float32)

    keys = jax.random.split(key, 8)
    ones = lambda shape: jnp.ones(shape, jnp.float32)
    zeros = lambda shape: jnp.zeros(shape, jnp.float32)
    return {
        "word_emb": nrm(keys[0], (VOCAB, HIDDEN)),
        "pos_emb": nrm(keys[1], (MAX_POS, HIDDEN)),
        "type_emb": nrm(keys[2], (2, HIDDEN)),
        "emb_ln_g": ones((1, HIDDEN)), "emb_ln_b": zeros((1, HIDDEN)),
        "pooler_w": nrm(keys[3], (HIDDEN, HIDDEN)), "pooler_b": zeros((1, HIDDEN)),
        # stacked per-layer weights (fused QKV)
        "wqkv": nrm(keys[4], (LAYERS, HIDDEN, 3 * HIDDEN)),
        "bqkv": zeros((LAYERS, 1, 3 * HIDDEN)),
        "wo": nrm(keys[5], (LAYERS, HIDDEN, HIDDEN)),
        "bo": zeros((LAYERS, 1, HIDDEN)),
        "ln1_g": ones((LAYERS, 1, HIDDEN)), "ln1_b": zeros((LAYERS, 1, HIDDEN)),
        "w1": nrm(keys[6], (LAYERS, HIDDEN, FF)),
        "b1": zeros((LAYERS, 1, FF)),
        "w2": nrm(keys[7], (LAYERS, FF, HIDDEN)),
        "b2": zeros((LAYERS, 1, HIDDEN)),
        "ln2_g": ones((LAYERS, 1, HIDDEN)), "ln2_b": zeros((LAYERS, 1, HIDDEN)),
    }


# ------------------------------- model forward -------------------------------
@functools.partial(jax.jit, static_argnames=("encoder_type",))
def model_forward(params, input_ids, attention_mask, encoder_type="fist-last-avg"):
    if encoder_type == "dissecting":
        # TODO(synk): 'dissecting' branch needs per-token QR decompositions
        # (np.linalg.qr in unify_token) which has no Pallas/TPU equivalent.
        raise NotImplementedError(encoder_type)

    B, S = input_ids.shape
    # only metadata-level reshapes/casts remain outside the kernel
    ids_col = input_ids.reshape(B * S, 1).astype(jnp.int32)
    mask_i = attention_mask.astype(jnp.int32)

    kernel = functools.partial(
        _fused_bert_kernel, batch=B, seq=S, encoder_type=encoder_type)

    args = [ids_col, mask_i,
            params["word_emb"], params["pos_emb"], params["type_emb"],
            params["emb_ln_g"], params["emb_ln_b"],
            params["wqkv"], params["bqkv"], params["wo"], params["bo"],
            params["ln1_g"], params["ln1_b"], params["w1"], params["b1"],
            params["w2"], params["b2"], params["ln2_g"], params["ln2_b"]]
    if encoder_type == "pooler":
        args += [params["pooler_w"], params["pooler_b"]]

    return pl.pallas_call(
        kernel,
        out_shape=jax.ShapeDtypeStruct((B, HIDDEN), jnp.float32),
        scratch_shapes=[pltpu.VMEM((B * S, HIDDEN), jnp.float32)],
    )(*args)


# ------------------------------------ main ------------------------------------
if __name__ == "__main__":
    key = jax.random.PRNGKey(0)
    pkey, ikey = jax.random.split(key)
    params = init_params(pkey)

    B, S = 2, 8
    input_ids = jax.random.randint(ikey, (B, S), 0, VOCAB, dtype=jnp.int32)
    attention_mask = jnp.array(
        [[1, 1, 1, 1, 1, 1, 1, 1],
         [1, 1, 1, 1, 1, 1, 0, 0]], dtype=jnp.int32)

    out = model_forward(params, input_ids, attention_mask,
                        encoder_type="fist-last-avg")
    out = jax.block_until_ready(out)
    assert out.shape == (B, HIDDEN) and out.dtype == jnp.float32
    assert bool(jnp.all(jnp.isfinite(out)))
    print("KERNEL_OK")
</pallas_src>

<mosaic_0001>
module attributes {stable_mosaic.version = 11 : i64} {
  func.func @_fused_bert_kernel(%arg0: memref<16x1xi32, #tpu.memory_space<vmem>>, %arg1: memref<2x8xi32, #tpu.memory_space<vmem>>, %arg2: memref<100x32xf32, #tpu.memory_space<vmem>>, %arg3: memref<16x32xf32, #tpu.memory_space<vmem>>, %arg4: memref<2x32xf32, #tpu.memory_space<vmem>>, %arg5: memref<1x32xf32, #tpu.memory_space<vmem>>, %arg6: memref<1x32xf32, #tpu.memory_space<vmem>>, %arg7: memref<2x32x96xf32, #tpu.memory_space<vmem>>, %arg8: memref<2x1x96xf32, #tpu.memory_space<vmem>>, %arg9: memref<2x32x32xf32, #tpu.memory_space<vmem>>, %arg10: memref<2x1x32xf32, #tpu.memory_space<vmem>>, %arg11: memref<2x1x32xf32, #tpu.memory_space<vmem>>, %arg12: memref<2x1x32xf32, #tpu.memory_space<vmem>>, %arg13: memref<2x32x64xf32, #tpu.memory_space<vmem>>, %arg14: memref<2x1x64xf32, #tpu.memory_space<vmem>>, %arg15: memref<2x64x32xf32, #tpu.memory_space<vmem>>, %arg16: memref<2x1x32xf32, #tpu.memory_space<vmem>>, %arg17: memref<2x1x32xf32, #tpu.memory_space<vmem>>, %arg18: memref<2x1x32xf32, #tpu.memory_space<vmem>>, %arg19: memref<2x32xf32, #tpu.memory_space<vmem>>, %arg20: memref<16x32xf32, #tpu.memory_space<vmem>>) attributes {dimension_semantics = [], scalar_prefetch = 0 : i64, scratch_operands = 1 : i64, tpu.core_type = #tpu.core_type<tc>} {
    %c0 = arith.constant 0 : index
    %c0_0 = arith.constant 0 : index
    %0 = vector.load %arg0[%c0, %c0_0] : memref<16x1xi32, #tpu.memory_space<vmem>>, vector<16x1xi32>
    %1 = tpu.iota {dimensions = array<i32: 1>} : vector<16x100xi32>
    %2 = vector.broadcast %0 : vector<16x1xi32> to vector<16x100xi32>
    %3 = arith.cmpi eq, %1, %2 : vector<16x100xi32>
    %cst = arith.constant 1.000000e+00 : f32
    %cst_1 = arith.constant 0.000000e+00 : f32
    %4 = vector.broadcast %cst : f32 to vector<16x100xf32>
    %5 = vector.broadcast %cst_1 : f32 to vector<16x100xf32>
    %6 = arith.select %3, %4, %5 : vector<16x100xi1>, vector<16x100xf32>
    %c0_2 = arith.constant 0 : index
    %c0_3 = arith.constant 0 : index
    %7 = vector.load %arg2[%c0_2, %c0_3] : memref<100x32xf32, #tpu.memory_space<vmem>>, vector<100x32xf32>
    %cst_4 = arith.constant dense<0.000000e+00> : vector<16x32xf32>
    %8 = tpu.matmul %6, %7, %cst_4 {dimension_numbers = #tpu.dot_dimension_numbers<[1], [0], [0], [1], [0, 0, 1, 1], [], []>} : vector<16x100xf32>, vector<100x32xf32>, vector<16x32xf32> -> vector<16x32xf32>
    %c0_5 = arith.constant 0 : index
    %c0_6 = arith.constant 0 : index
    %9 = vector.load %arg3[%c0_5, %c0_6] : memref<16x32xf32, #tpu.memory_space<vmem>>, vector<8x32xf32>
    %10 = tpu.concatenate %9, %9 in 0 : vector<8x32xf32>, vector<8x32xf32> -> vector<16x32xf32>
    %11 = arith.addf %8, %10 : vector<16x32xf32>
    %c0_7 = arith.constant 0 : index
    %c0_8 = arith.constant 0 : index
    %12 = vector.load %arg4[%c0_7, %c0_8] : memref<2x32xf32, #tpu.memory_space<vmem>>, vector<1x32xf32>
    %13 = vector.broadcast %12 : vector<1x32xf32> to vector<16x32xf32>
    %14 = arith.addf %11, %13 : vector<16x32xf32>
    %c0_9 = arith.constant 0 : index
    %c0_10 = arith.constant 0 : index
    %15 = vector.load %arg5[%c0_9, %c0_10] : memref<1x32xf32, #tpu.memory_space<vmem>>, vector<1x32xf32>
    %c0_11 = arith.constant 0 : index
    %c0_12 = arith.constant 0 : index
    %16 = vector.load %arg6[%c0_11, %c0_12] : memref<1x32xf32, #tpu.memory_space<vmem>>, vector<1x32xf32>
    %cst_13 = arith.constant dense<0.000000e+00> : vector<16xf32>
    %17 = vector.multi_reduction <add>, %14, %cst_13 [1] : vector<16x32xf32> to vector<16xf32>
    %18 = vector.shape_cast %17 : vector<16xf32> to vector<16x1xf32>
    %cst_14 = arith.constant 3.200000e+01 : f32
    %19 = vector.broadcast %cst_14 : f32 to vector<16x1xf32>
    %20 = arith.divf %18, %19 : vector<16x1xf32>
    %21 = vector.broadcast %20 : vector<16x1xf32> to vector<16x32xf32>
    %22 = arith.subf %14, %21 : vector<16x32xf32>
    %23 = arith.mulf %22, %22 : vector<16x32xf32>
    %cst_15 = arith.constant dense<0.000000e+00> : vector<16xf32>
    %24 = vector.multi_reduction <add>, %23, %cst_15 [1] : vector<16x32xf32> to vector<16xf32>
    %25 = vector.shape_cast %24 : vector<16xf32> to vector<16x1xf32>
    %cst_16 = arith.constant 3.200000e+01 : f32
    %26 = vector.broadcast %cst_16 : f32 to vector<16x1xf32>
    %27 = arith.divf %25, %26 : vector<16x1xf32>
    %28 = vector.broadcast %20 : vector<16x1xf32> to vector<16x32xf32>
    %29 = arith.subf %14, %28 : vector<16x32xf32>
    %cst_17 = arith.constant 9.99999996E-13 : f32
    %30 = vector.broadcast %cst_17 : f32 to vector<16x1xf32>
    %31 = arith.addf %27, %30 : vector<16x1xf32>
    %32 = math.rsqrt %31 : vector<16x1xf32>
    %33 = vector.broadcast %32 : vector<16x1xf32> to vector<16x32xf32>
    %34 = arith.mulf %29, %33 : vector<16x32xf32>
    %35 = vector.broadcast %15 : vector<1x32xf32> to vector<16x32xf32>
    %36 = arith.mulf %34, %35 : vector<16x32xf32>
    %37 = vector.broadcast %16 : vector<1x32xf32> to vector<16x32xf32>
    %38 = arith.addf %36, %37 : vector<16x32xf32>
    %c0_18 = arith.constant 0 : index
    %c0_19 = arith.constant 0 : index
    %39 = vector.load %arg1[%c0_18, %c0_19] : memref<2x8xi32, #tpu.memory_space<vmem>>, vector<2x8xi32>
    %40 = arith.sitofp %39 : vector<2x8xi32> to vector<2x8xf32>
    %cst_20 = arith.constant 1.000000e+00 : f32
    %41 = vector.broadcast %cst_20 : f32 to vector<2x8xf32>
    %42 = arith.subf %41, %40 : vector<2x8xf32>
    %cst_21 = arith.constant -1.000000e+09 : f32
    %43 = vector.broadcast %cst_21 : f32 to vector<2x8xf32>
    %44 = arith.mulf %42, %43 : vector<2x8xf32>
    %45 = vector.extract_strided_slice %44 {offsets = [0, 0], sizes = [1, 8], strides = [1, 1]} : vector<2x8xf32> to vector<1x8xf32>
    %46 = vector.shape_cast %45 : vector<1x8xf32> to vector<1x1x8xf32>
    %47 = vector.extract_strided_slice %44 {offsets = [0, 0], sizes = [1, 8], strides = [1, 1]} : vector<2x8xf32> to vector<1x8xf32>
    %48 = vector.shape_cast %47 : vector<1x8xf32> to vector<1x1x8xf32>
    %49 = vector.extract_strided_slice %44 {offsets = [1, 0], sizes = [1, 8], strides = [1, 1]} : vector<2x8xf32> to vector<1x8xf32>
    %50 = vector.shape_cast %49 : vector<1x8xf32> to vector<1x1x8xf32>
    %51 = vector.extract_strided_slice %44 {offsets = [1, 0], sizes = [1, 8], strides = [1, 1]} : vector<2x8xf32> to vector<1x8xf32>
    %52 = vector.shape_cast %51 : vector<1x8xf32> to vector<1x1x8xf32>
    %53 = tpu.concatenate %46, %48, %50, %52 in 0 : vector<1x1x8xf32>, vector<1x1x8xf32>, vector<1x1x8xf32>, vector<1x1x8xf32> -> vector<4x1x8xf32>
    %c0_22 = arith.constant 0 : index
    %c0_23 = arith.constant 0 : index
    %c0_24 = arith.constant 0 : index
    %54 = vector.load %arg7[%c0_22, %c0_23, %c0_24] : memref<2x32x96xf32, #tpu.memory_space<vmem>>, vector<1x32x96xf32>
    %55 = vector.shape_cast %54 : vector<1x32x96xf32> to vector<32x96xf32>
    %cst_25 = arith.constant dense<0.000000e+00> : vector<16x96xf32>
    %56 = tpu.matmul %38, %55, %cst_25 {dimension_numbers = #tpu.dot_dimension_numbers<[1], [0], [0], [1], [0, 0, 1, 1], [], []>} : vector<16x32xf32>, vector<32x96xf32>, vector<16x96xf32> -> vector<16x96xf32>
    %c0_26 = arith.constant 0 : index
    %c0_27 = arith.constant 0 : index
    %c0_28 = arith.constant 0 : index
    %57 = vector.load %arg8[%c0_26, %c0_27, %c0_28] : memref<2x1x96xf32, #tpu.memory_space<vmem>>, vector<1x1x96xf32>
    %58 = vector.shape_cast %57 : vector<1x1x96xf32> to vector<1x96xf32>
    %59 = vector.broadcast %58 : vector<1x96xf32> to vector<16x96xf32>
    %60 = arith.addf %56, %59 : vector<16x96xf32>
    %61 = vector.extract_strided_slice %60 {offsets = [0, 0], sizes = [16, 32], strides = [1, 1]} : vector<16x96xf32> to vector<16x32xf32>
    %62 = vector.extract_strided_slice %61 {offsets = [0, 0], sizes = [8, 16], strides = [1, 1]} : vector<16x32xf32> to vector<8x16xf32>
    %63 = vector.shape_cast %62 : vector<8x16xf32> to vector<1x8x16xf32>
    %64 = vector.extract_strided_slice %61 {offsets = [0, 16], sizes = [8, 16], strides = [1, 1]} : vector<16x32xf32> to vector<8x16xf32>
    %65 = vector.shape_cast %64 : vector<8x16xf32> to vector<1x8x16xf32>
    %66 = vector.extract_strided_slice %61 {offsets = [8, 0], sizes = [8, 16], strides = [1, 1]} : vector<16x32xf32> to vector<8x16xf32>
    %67 = vector.shape_cast %66 : vector<8x16xf32> to vector<1x8x16xf32>
    %68 = vector.extract_strided_slice %61 {offsets = [8, 16], sizes = [8, 16], strides = [1, 1]} : vector<16x32xf32> to vector<8x16xf32>
    %69 = vector.shape_cast %68 : vector<8x16xf32> to vector<1x8x16xf32>
    %70 = tpu.concatenate %63, %65, %67, %69 in 0 : vector<1x8x16xf32>, vector<1x8x16xf32>, vector<1x8x16xf32>, vector<1x8x16xf32> -> vector<4x8x16xf32>
    %71 = vector.extract_strided_slice %60 {offsets = [0, 32], sizes = [16, 32], strides = [1, 1]} : vector<16x96xf32> to vector<16x32xf32>
    %72 = vector.extract_strided_slice %71 {offsets = [0, 0], sizes = [8, 16], strides = [1, 1]} : vector<16x32xf32> to vector<8x16xf32>
    %73 = vector.shape_cast %72 : vector<8x16xf32> to vector<1x8x16xf32>
    %74 = vector.extract_strided_slice %71 {offsets = [0, 16], sizes = [8, 16], strides = [1, 1]} : vector<16x32xf32> to vector<8x16xf32>
    %75 = vector.shape_cast %74 : vector<8x16xf32> to vector<1x8x16xf32>
    %76 = vector.extract_strided_slice %71 {offsets = [8, 0], sizes = [8, 16], strides = [1, 1]} : vector<16x32xf32> to vector<8x16xf32>
    %77 = vector.shape_cast %76 : vector<8x16xf32> to vector<1x8x16xf32>
    %78 = vector.extract_strided_slice %71 {offsets = [8, 16], sizes = [8, 16], strides = [1, 1]} : vector<16x32xf32> to vector<8x16xf32>
    %79 = vector.shape_cast %78 : vector<8x16xf32> to vector<1x8x16xf32>
    %80 = tpu.concatenate %73, %75, %77, %79 in 0 : vector<1x8x16xf32>, vector<1x8x16xf32>, vector<1x8x16xf32>, vector<1x8x16xf32> -> vector<4x8x16xf32>
    %81 = vector.extract_strided_slice %60 {offsets = [0, 64], sizes = [16, 32], strides = [1, 1]} : vector<16x96xf32> to vector<16x32xf32>
    %82 = vector.extract_strided_slice %81 {offsets = [0, 0], sizes = [8, 16], strides = [1, 1]} : vector<16x32xf32> to vector<8x16xf32>
    %83 = vector.shape_cast %82 : vector<8x16xf32> to vector<1x8x16xf32>
    %84 = vector.extract_strided_slice %81 {offsets = [0, 16], sizes = [8, 16], strides = [1, 1]} : vector<16x32xf32> to vector<8x16xf32>
    %85 = vector.shape_cast %84 : vector<8x16xf32> to vector<1x8x16xf32>
    %86 = vector.extract_strided_slice %81 {offsets = [8, 0], sizes = [8, 16], strides = [1, 1]} : vector<16x32xf32> to vector<8x16xf32>
    %87 = vector.shape_cast %86 : vector<8x16xf32> to vector<1x8x16xf32>
    %88 = vector.extract_strided_slice %81 {offsets = [8, 16], sizes = [8, 16], strides = [1, 1]} : vector<16x32xf32> to vector<8x16xf32>
    %89 = vector.shape_cast %88 : vector<8x16xf32> to vector<1x8x16xf32>
    %90 = tpu.concatenate %83, %85, %87, %89 in 0 : vector<1x8x16xf32>, vector<1x8x16xf32>, vector<1x8x16xf32>, vector<1x8x16xf32> -> vector<4x8x16xf32>
    "tpu.trace_start"() <{level = 10 : i32, message = "bqd,bkd->bqk"}> : () -> ()
    %cst_29 = arith.constant dense<0.000000e+00> : vector<4x8x8xf32>
    %91 = tpu.matmul %70, %80, %cst_29 {dimension_numbers = #tpu.dot_dimension_numbers<[2], [2], [1], [1], [0, 0, 0, 1, 1, 1], [0], [0]>} : vector<4x8x16xf32>, vector<4x8x16xf32>, vector<4x8x8xf32> -> vector<4x8x8xf32>
    "tpu.trace_stop"() : () -> ()
    %cst_30 = arith.constant 2.500000e-01 : f32
    %92 = vector.broadcast %cst_30 : f32 to vector<4x8x8xf32>
    %93 = arith.mulf %91, %92 : vector<4x8x8xf32>
    %94 = vector.broadcast %53 : vector<4x1x8xf32> to vector<4x8x8xf32>
    %95 = arith.addf %93, %94 : vector<4x8x8xf32>
    %cst_31 = arith.constant dense<0xFF800000> : vector<4x8xf32>
    %96 = vector.multi_reduction <maximumf>, %95, %cst_31 [2] : vector<4x8x8xf32> to vector<4x8xf32>
    %97 = vector.shape_cast %96 : vector<4x8xf32> to vector<4x8x1xf32>
    %98 = vector.broadcast %97 : vector<4x8x1xf32> to vector<4x8x8xf32>
    %99 = arith.subf %95, %98 : vector<4x8x8xf32>
    %100 = math.exp %99 : vector<4x8x8xf32>
    %cst_32 = arith.constant dense<0.000000e+00> : vector<4x8xf32>
    %101 = vector.multi_reduction <add>, %100, %cst_32 [2] : vector<4x8x8xf32> to vector<4x8xf32>
    %102 = vector.shape_cast %101 : vector<4x8xf32> to vector<4x8x1xf32>
    %103 = vector.broadcast %102 : vector<4x8x1xf32> to vector<4x8x8xf32>
    %104 = arith.divf %100, %103 : vector<4x8x8xf32>
    "tpu.trace_start"() <{level = 10 : i32, message = "bqk,bkd->bqd"}> : () -> ()
    %cst_33 = arith.constant dense<0.000000e+00> : vector<4x8x16xf32>
    %105 = tpu.matmul %104, %90, %cst_33 {dimension_numbers = #tpu.dot_dimension_numbers<[2], [1], [1], [2], [0, 0, 0, 1, 1, 2], [0], [0]>} : vector<4x8x8xf32>, vector<4x8x16xf32>, vector<4x8x16xf32> -> vector<4x8x16xf32>
    "tpu.trace_stop"() : () -> ()
    %106 = vector.extract_strided_slice %105 {offsets = [0, 0, 0], sizes = [1, 8, 16], strides = [1, 1, 1]} : vector<4x8x16xf32> to vector<1x8x16xf32>
    %107 = vector.shape_cast %106 : vector<1x8x16xf32> to vector<8x16xf32>
    %c0_34 = arith.constant 0 : index
    %c0_35 = arith.constant 0 : index
    %108 = vector.load %arg20[%c0_34, %c0_35] : memref<16x32xf32, #tpu.memory_space<vmem>>, vector<8x16xf32>
    tpu.vector_store %arg20[%c0_34, %c0_35], %107 {strides = array<i32>} : memref<16x32xf32, #tpu.memory_space<vmem>>, vector<8x16xf32>,
    %109 = vector.extract_strided_slice %105 {offsets = [1, 0, 0], sizes = [1, 8, 16], strides = [1, 1, 1]} : vector<4x8x16xf32> to vector<1x8x16xf32>
    %110 = vector.shape_cast %109 : vector<1x8x16xf32> to vector<8x16xf32>
    %c0_36 = arith.constant 0 : index
    %c16 = arith.constant 16 : index
    %111 = vector.load %arg20[%c0_36, %c16] : memref<16x32xf32, #tpu.memory_space<vmem>>, vector<8x16xf32>
    tpu.vector_store %arg20[%c0_36, %c16], %110 {strides = array<i32>} : memref<16x32xf32, #tpu.memory_space<vmem>>, vector<8x16xf32>,
    %112 = vector.extract_strided_slice %105 {offsets = [2, 0, 0], sizes = [1, 8, 16], strides = [1, 1, 1]} : vector<4x8x16xf32> to vector<1x8x16xf32>
    %113 = vector.shape_cast %112 : vector<1x8x16xf32> to vector<8x16xf32>
    %c8 = arith.constant 8 : index
    %c0_37 = arith.constant 0 : index
    %114 = vector.load %arg20[%c8, %c0_37] : memref<16x32xf32, #tpu.memory_space<vmem>>, vector<8x16xf32>
    tpu.vector_store %arg20[%c8, %c0_37], %113 {strides = array<i32>} : memref<16x32xf32, #tpu.memory_space<vmem>>, vector<8x16xf32>,
    %115 = vector.extract_strided_slice %105 {offsets = [3, 0, 0], sizes = [1, 8, 16], strides = [1, 1, 1]} : vector<4x8x16xf32> to vector<1x8x16xf32>
    %116 = vector.shape_cast %115 : vector<1x8x16xf32> to vector<8x16xf32>
    %c8_38 = arith.constant 8 : index
    %c16_39 = arith.constant 16 : index
    %117 = vector.load %arg20[%c8_38, %c16_39] : memref<16x32xf32, #tpu.memory_space<vmem>>, vector<8x16xf32>
    tpu.vector_store %arg20[%c8_38, %c16_39], %116 {strides = array<i32>} : memref<16x32xf32, #tpu.memory_space<vmem>>, vector<8x16xf32>,
    %c0_40 = arith.constant 0 : index
    %c0_41 = arith.constant 0 : index
    %118 = vector.load %arg20[%c0_40, %c0_41] : memref<16x32xf32, #tpu.memory_space<vmem>>, vector<16x32xf32>
    %c0_42 = arith.constant 0 : index
    %c0_43 = arith.constant 0 : index
    %c0_44 = arith.constant 0 : index
    %119 = vector.load %arg9[%c0_42, %c0_43, %c0_44] : memref<2x32x32xf32, #tpu.memory_space<vmem>>, vector<1x32x32xf32>
    %120 = vector.shape_cast %119 : vector<1x32x32xf32> to vector<32x32xf32>
    %cst_45 = arith.constant dense<0.000000e+00> : vector<16x32xf32>
    %121 = tpu.matmul %118, %120, %cst_45 {dimension_numbers = #tpu.dot_dimension_numbers<[1], [0], [0], [1], [0, 0, 1, 1], [], []>} : vector<16x32xf32>, vector<32x32xf32>, vector<16x32xf32> -> vector<16x32xf32>
    %c0_46 = arith.constant 0 : index
    %c0_47 = arith.constant 0 : index
    %c0_48 = arith.constant 0 : index
    %122 = vector.load %arg10[%c0_46, %c0_47, %c0_48] : memref<2x1x32xf32, #tpu.memory_space<vmem>>, vector<1x1x32xf32>
    %123 = vector.shape_cast %122 : vector<1x1x32xf32> to vector<1x32xf32>
    %124 = vector.broadcast %123 : vector<1x32xf32> to vector<16x32xf32>
    %125 = arith.addf %121, %124 : vector<16x32xf32>
    %126 = arith.addf %38, %125 : vector<16x32xf32>
    %c0_49 = arith.constant 0 : index
    %c0_50 = arith.constant 0 : index
    %c0_51 = arith.constant 0 : index
    %127 = vector.load %arg11[%c0_49, %c0_50, %c0_51] : memref<2x1x32xf32, #tpu.memory_space<vmem>>, vector<1x1x32xf32>
    %128 = vector.shape_cast %127 : vector<1x1x32xf32> to vector<1x32xf32>
    %c0_52 = arith.constant 0 : index
    %c0_53 = arith.constant 0 : index
    %c0_54 = arith.constant 0 : index
    %129 = vector.load %arg12[%c0_52, %c0_53, %c0_54] : memref<2x1x32xf32, #tpu.memory_space<vmem>>, vector<1x1x32xf32>
    %130 = vector.shape_cast %129 : vector<1x1x32xf32> to vector<1x32xf32>
    %cst_55 = arith.constant dense<0.000000e+00> : vector<16xf32>
    %131 = vector.multi_reduction <add>, %126, %cst_55 [1] : vector<16x32xf32> to vector<16xf32>
    %132 = vector.shape_cast %131 : vector<16xf32> to vector<16x1xf32>
    %cst_56 = arith.constant 3.200000e+01 : f32
    %133 = vector.broadcast %cst_56 : f32 to vector<16x1xf32>
    %134 = arith.divf %132, %133 : vector<16x1xf32>
    %135 = vector.broadcast %134 : vector<16x1xf32> to vector<16x32xf32>
    %136 = arith.subf %126, %135 : vector<16x32xf32>
    %137 = arith.mulf %136, %136 : vector<16x32xf32>
    %cst_57 = arith.constant dense<0.000000e+00> : vector<16xf32>
    %138 = vector.multi_reduction <add>, %137, %cst_57 [1] : vector<16x32xf32> to vector<16xf32>
    %139 = vector.shape_cast %138 : vector<16xf32> to vector<16x1xf32>
    %cst_58 = arith.constant 3.200000e+01 : f32
    %140 = vector.broadcast %cst_58 : f32 to vector<16x1xf32>
    %141 = arith.divf %139, %140 : vector<16x1xf32>
    %142 = vector.broadcast %134 : vector<16x1xf32> to vector<16x32xf32>
    %143 = arith.subf %126, %142 : vector<16x32xf32>
    %cst_59 = arith.constant 9.99999996E-13 : f32
    %144 = vector.broadcast %cst_59 : f32 to vector<16x1xf32>
    %145 = arith.addf %141, %144 : vector<16x1xf32>
    %146 = math.rsqrt %145 : vector<16x1xf32>
    %147 = vector.broadcast %146 : vector<16x1xf32> to vector<16x32xf32>
    %148 = arith.mulf %143, %147 : vector<16x32xf32>
    %149 = vector.broadcast %128 : vector<1x32xf32> to vector<16x32xf32>
    %150 = arith.mulf %148, %149 : vector<16x32xf32>
    %151 = vector.broadcast %130 : vector<1x32xf32> to vector<16x32xf32>
    %152 = arith.addf %150, %151 : vector<16x32xf32>
    %c0_60 = arith.constant 0 : index
    %c0_61 = arith.constant 0 : index
    %c0_62 = arith.constant 0 : index
    %153 = vector.load %arg13[%c0_60, %c0_61, %c0_62] : memref<2x32x64xf32, #tpu.memory_space<vmem>>, vector<1x32x64xf32>
    %154 = vector.shape_cast %153 : vector<1x32x64xf32> to vector<32x64xf32>
    %cst_63 = arith.constant dense<0.000000e+00> : vector<16x64xf32>
    %155 = tpu.matmul %152, %154, %cst_63 {dimension_numbers = #tpu.dot_dimension_numbers<[1], [0], [0], [1], [0, 0, 1, 1], [], []>} : vector<16x32xf32>, vector<32x64xf32>, vector<16x64xf32> -> vector<16x64xf32>
    %c0_64 = arith.constant 0 : index
    %c0_65 = arith.constant 0 : index
    %c0_66 = arith.constant 0 : index
    %156 = vector.load %arg14[%c0_64, %c0_65, %c0_66] : memref<2x1x64xf32, #tpu.memory_space<vmem>>, vector<1x1x64xf32>
    %157 = vector.shape_cast %156 : vector<1x1x64xf32> to vector<1x64xf32>
    %158 = vector.broadcast %157 : vector<1x64xf32> to vector<16x64xf32>
    %159 = arith.addf %155, %158 : vector<16x64xf32>
    %160 = arith.mulf %159, %159 : vector<16x64xf32>
    %161 = arith.mulf %159, %160 : vector<16x64xf32>
    %cst_67 = arith.constant 4.471500e-02 : f32
    %162 = vector.broadcast %cst_67 : f32 to vector<16x64xf32>
    %163 = arith.mulf %162, %161 : vector<16x64xf32>
    %164 = arith.addf %159, %163 : vector<16x64xf32>
    %cst_68 = arith.constant 0.797884583 : f32
    %165 = vector.broadcast %cst_68 : f32 to vector<16x64xf32>
    %166 = arith.mulf %165, %164 : vector<16x64xf32>
    %167 = math.tanh %166 : vector<16x64xf32>
    %cst_69 = arith.constant 1.000000e+00 : f32
    %168 = vector.broadcast %cst_69 : f32 to vector<16x64xf32>
    %169 = arith.addf %168, %167 : vector<16x64xf32>
    %cst_70 = arith.constant 5.000000e-01 : f32
    %170 = vector.broadcast %cst_70 : f32 to vector<16x64xf32>
    %171 = arith.mulf %170, %169 : vector<16x64xf32>
    %172 = arith.mulf %159, %171 : vector<16x64xf32>
    %c0_71 = arith.constant 0 : index
    %c0_72 = arith.constant 0 : index
    %c0_73 = arith.constant 0 : index
    %173 = vector.load %arg15[%c0_71, %c0_72, %c0_73] : memref<2x64x32xf32, #tpu.memory_space<vmem>>, vector<1x64x32xf32>
    %174 = vector.shape_cast %173 : vector<1x64x32xf32> to vector<64x32xf32>
    %cst_74 = arith.constant dense<0.000000e+00> : vector<16x32xf32>
    %175 = tpu.matmul %172, %174, %cst_74 {dimension_numbers = #tpu.dot_dimension_numbers<[1], [0], [0], [1], [0, 0, 1, 1], [], []>} : vector<16x64xf32>, vector<64x32xf32>, vector<16x32xf32> -> vector<16x32xf32>
    %c0_75 = arith.constant 0 : index
    %c0_76 = arith.constant 0 : index
    %c0_77 = arith.constant 0 : index
    %176 = vector.load %arg16[%c0_75, %c0_76, %c0_77] : memref<2x1x32xf32, #tpu.memory_space<vmem>>, vector<1x1x32xf32>
    %177 = vector.shape_cast %176 : vector<1x1x32xf32> to vector<1x32xf32>
    %178 = vector.broadcast %177 : vector<1x32xf32> to vector<16x32xf32>
    %179 = arith.addf %175, %178 : vector<16x32xf32>
    %180 = arith.addf %152, %179 : vector<16x32xf32>
    %c0_78 = arith.constant 0 : index
    %c0_79 = arith.constant 0 : index
    %c0_80 = arith.constant 0 : index
    %181 = vector.load %arg17[%c0_78, %c0_79, %c0_80] : memref<2x1x32xf32, #tpu.memory_space<vmem>>, vector<1x1x32xf32>
    %182 = vector.shape_cast %181 : vector<1x1x32xf32> to vector<1x32xf32>
    %c0_81 = arith.constant 0 : index
    %c0_82 = arith.constant 0 : index
    %c0_83 = arith.constant 0 : index
    %183 = vector.load %arg18[%c0_81, %c0_82, %c0_83] : memref<2x1x32xf32, #tpu.memory_space<vmem>>, vector<1x1x32xf32>
    %184 = vector.shape_cast %183 : vector<1x1x32xf32> to vector<1x32xf32>
    %cst_84 = arith.constant dense<0.000000e+00> : vector<16xf32>
    %185 = vector.multi_reduction <add>, %180, %cst_84 [1] : vector<16x32xf32> to vector<16xf32>
    %186 = vector.shape_cast %185 : vector<16xf32> to vector<16x1xf32>
    %cst_85 = arith.constant 3.200000e+01 : f32
    %187 = vector.broadcast %cst_85 : f32 to vector<16x1xf32>
    %188 = arith.divf %186, %187 : vector<16x1xf32>
    %189 = vector.broadcast %188 : vector<16x1xf32> to vector<16x32xf32>
    %190 = arith.subf %180, %189 : vector<16x32xf32>
    %191 = arith.mulf %190, %190 : vector<16x32xf32>
    %cst_86 = arith.constant dense<0.000000e+00> : vector<16xf32>
    %192 = vector.multi_reduction <add>, %191, %cst_86 [1] : vector<16x32xf32> to vector<16xf32>
    %193 = vector.shape_cast %192 : vector<16xf32> to vector<16x1xf32>
    %cst_87 = arith.constant 3.200000e+01 : f32
    %194 = vector.broadcast %cst_87 : f32 to vector<16x1xf32>
    %195 = arith.divf %193, %194 : vector<16x1xf32>
    %196 = vector.broadcast %188 : vector<16x1xf32> to vector<16x32xf32>
    %197 = arith.subf %180, %196 : vector<16x32xf32>
    %cst_88 = arith.constant 9.99999996E-13 : f32
    %198 = vector.broadcast %cst_88 : f32 to vector<16x1xf32>
    %199 = arith.addf %195, %198 : vector<16x1xf32>
    %200 = math.rsqrt %199 : vector<16x1xf32>
    %201 = vector.broadcast %200 : vector<16x1xf32> to vector<16x32xf32>
    %202 = arith.mulf %197, %201 : vector<16x32xf32>
    %203 = vector.broadcast %182 : vector<1x32xf32> to vector<16x32xf32>
    %204 = arith.mulf %202, %203 : vector<16x32xf32>
    %205 = vector.broadcast %184 : vector<1x32xf32> to vector<16x32xf32>
    %206 = arith.addf %204, %205 : vector<16x32xf32>
    %c1 = arith.constant 1 : index
    %c0_89 = arith.constant 0 : index
    %c0_90 = arith.constant 0 : index
    %207 = vector.load %arg7[%c1, %c0_89, %c0_90] : memref<2x32x96xf32, #tpu.memory_space<vmem>>, vector<1x32x96xf32>
    %208 = vector.shape_cast %207 : vector<1x32x96xf32> to vector<32x96xf32>
    %cst_91 = arith.constant dense<0.000000e+00> : vector<16x96xf32>
    %209 = tpu.matmul %206, %208, %cst_91 {dimension_numbers = #tpu.dot_dimension_numbers<[1], [0], [0], [1], [0, 0, 1, 1], [], []>} : vector<16x32xf32>, vector<32x96xf32>, vector<16x96xf32> -> vector<16x96xf32>
    %c1_92 = arith.constant 1 : index
    %c0_93 = arith.constant 0 : index
    %c0_94 = arith.constant 0 : index
    %210 = vector.load %arg8[%c1_92, %c0_93, %c0_94] : memref<2x1x96xf32, #tpu.memory_space<vmem>>, vector<1x1x96xf32>
    %211 = vector.shape_cast %210 : vector<1x1x96xf32> to vector<1x96xf32>
    %212 = vector.broadcast %211 : vector<1x96xf32> to vector<16x96xf32>
    %213 = arith.addf %209, %212 : vector<16x96xf32>
    %214 = vector.extract_strided_slice %213 {offsets = [0, 0], sizes = [16, 32], strides = [1, 1]} : vector<16x96xf32> to vector<16x32xf32>
    %215 = vector.extract_strided_slice %214 {offsets = [0, 0], sizes = [8, 16], strides = [1, 1]} : vector<16x32xf32> to vector<8x16xf32>
    %216 = vector.shape_cast %215 : vector<8x16xf32> to vector<1x8x16xf32>
    %217 = vector.extract_strided_slice %214 {offsets = [0, 16], sizes = [8, 16], strides = [1, 1]} : vector<16x32xf32> to vector<8x16xf32>
    %218 = vector.shape_cast %217 : vector<8x16xf32> to vector<1x8x16xf32>
    %219 = vector.extract_strided_slice %214 {offsets = [8, 0], sizes = [8, 16], strides = [1, 1]} : vector<16x32xf32> to vector<8x16xf32>
    %220 = vector.shape_cast %219 : vector<8x16xf32> to vector<1x8x16xf32>
    %221 = vector.extract_strided_slice %214 {offsets = [8, 16], sizes = [8, 16], strides = [1, 1]} : vector<16x32xf32> to vector<8x16xf32>
    %222 = vector.shape_cast %221 : vector<8x16xf32> to vector<1x8x16xf32>
    %223 = tpu.concatenate %216, %218, %220, %222 in 0 : vector<1x8x16xf32>, vector<1x8x16xf32>, vector<1x8x16xf32>, vector<1x8x16xf32> -> vector<4x8x16xf32>
    %224 = vector.extract_strided_slice %213 {offsets = [0, 32], sizes = [16, 32], strides = [1, 1]} : vector<16x96xf32> to vector<16x32xf32>
    %225 = vector.extract_strided_slice %224 {offsets = [0, 0], sizes = [8, 16], strides = [1, 1]} : vector<16x32xf32> to vector<8x16xf32>
    %226 = vector.shape_cast %225 : vector<8x16xf32> to vector<1x8x16xf32>
    %227 = vector.extract_strided_slice %224 {offsets = [0, 16], sizes = [8, 16], strides = [1, 1]} : vector<16x32xf32> to vector<8x16xf32>
    %228 = vector.shape_cast %227 : vector<8x16xf32> to vector<1x8x16xf32>
    %229 = vector.extract_strided_slice %224 {offsets = [8, 0], sizes = [8, 16], strides = [1, 1]} : vector<16x32xf32> to vector<8x16xf32>
    %230 = vector.shape_cast %229 : vector<8x16xf32> to vector<1x8x16xf32>
    %231 = vector.extract_strided_slice %224 {offsets = [8, 16], sizes = [8, 16], strides = [1, 1]} : vector<16x32xf32> to vector<8x16xf32>
    %232 = vector.shape_cast %231 : vector<8x16xf32> to vector<1x8x16xf32>
    %233 = tpu.concatenate %226, %228, %230, %232 in 0 : vector<1x8x16xf32>, vector<1x8x16xf32>, vector<1x8x16xf32>, vector<1x8x16xf32> -> vector<4x8x16xf32>
    %234 = vector.extract_strided_slice %213 {offsets = [0, 64], sizes = [16, 32], strides = [1, 1]} : vector<16x96xf32> to vector<16x32xf32>
    %235 = vector.extract_strided_slice %234 {offsets = [0, 0], sizes = [8, 16], strides = [1, 1]} : vector<16x32xf32> to vector<8x16xf32>
    %236 = vector.shape_cast %235 : vector<8x16xf32> to vector<1x8x16xf32>
    %237 = vector.extract_strided_slice %234 {offsets = [0, 16], sizes = [8, 16], strides = [1, 1]} : vector<16x32xf32> to vector<8x16xf32>
    %238 = vector.shape_cast %237 : vector<8x16xf32> to vector<1x8x16xf32>
    %239 = vector.extract_strided_slice %234 {offsets = [8, 0], sizes = [8, 16], strides = [1, 1]} : vector<16x32xf32> to vector<8x16xf32>
    %240 = vector.shape_cast %239 : vector<8x16xf32> to vector<1x8x16xf32>
    %241 = vector.extract_strided_slice %234 {offsets = [8, 16], sizes = [8, 16], strides = [1, 1]} : vector<16x32xf32> to vector<8x16xf32>
    %242 = vector.shape_cast %241 : vector<8x16xf32> to vector<1x8x16xf32>
    %243 = tpu.concatenate %236, %238, %240, %242 in 0 : vector<1x8x16xf32>, vector<1x8x16xf32>, vector<1x8x16xf32>, vector<1x8x16xf32> -> vector<4x8x16xf32>
    "tpu.trace_start"() <{level = 10 : i32, message = "bqd,bkd->bqk"}> : () -> ()
    %cst_95 = arith.constant dense<0.000000e+00> : vector<4x8x8xf32>
    %244 = tpu.matmul %223, %233, %cst_95 {dimension_numbers = #tpu.dot_dimension_numbers<[2], [2], [1], [1], [0, 0, 0, 1, 1, 1], [0], [0]>} : vector<4x8x16xf32>, vector<4x8x16xf32>, vector<4x8x8xf32> -> vector<4x8x8xf32>
    "tpu.trace_stop"() : () -> ()
    %cst_96 = arith.constant 2.500000e-01 : f32
    %245 = vector.broadcast %cst_96 : f32 to vector<4x8x8xf32>
    %246 = arith.mulf %244, %245 : vector<4x8x8xf32>
    %247 = vector.broadcast %53 : vector<4x1x8xf32> to vector<4x8x8xf32>
    %248 = arith.addf %246, %247 : vector<4x8x8xf32>
    %cst_97 = arith.constant dense<0xFF800000> : vector<4x8xf32>
    %249 = vector.multi_reduction <maximumf>, %248, %cst_97 [2] : vector<4x8x8xf32> to vector<4x8xf32>
    %250 = vector.shape_cast %249 : vector<4x8xf32> to vector<4x8x1xf32>
    %251 = vector.broadcast %250 : vector<4x8x1xf32> to vector<4x8x8xf32>
    %252 = arith.subf %248, %251 : vector<4x8x8xf32>
    %253 = math.exp %252 : vector<4x8x8xf32>
    %cst_98 = arith.constant dense<0.000000e+00> : vector<4x8xf32>
    %254 = vector.multi_reduction <add>, %253, %cst_98 [2] : vector<4x8x8xf32> to vector<4x8xf32>
    %255 = vector.shape_cast %254 : vector<4x8xf32> to vector<4x8x1xf32>
    %256 = vector.broadcast %255 : vector<4x8x1xf32> to vector<4x8x8xf32>
    %257 = arith.divf %253, %256 : vector<4x8x8xf32>
    "tpu.trace_start"() <{level = 10 : i32, message = "bqk,bkd->bqd"}> : () -> ()
    %cst_99 = arith.constant dense<0.000000e+00> : vector<4x8x16xf32>
    %258 = tpu.matmul %257, %243, %cst_99 {dimension_numbers = #tpu.dot_dimension_numbers<[2], [1], [1], [2], [0, 0, 0, 1, 1, 2], [0], [0]>} : vector<4x8x8xf32>, vector<4x8x16xf32>, vector<4x8x16xf32> -> vector<4x8x16xf32>
    "tpu.trace_stop"() : () -> ()
    %259 = vector.extract_strided_slice %258 {offsets = [0, 0, 0], sizes = [1, 8, 16], strides = [1, 1, 1]} : vector<4x8x16xf32> to vector<1x8x16xf32>
    %260 = vector.shape_cast %259 : vector<1x8x16xf32> to vector<8x16xf32>
    %c0_100 = arith.constant 0 : index
    %c0_101 = arith.constant 0 : index
    %261 = vector.load %arg20[%c0_100, %c0_101] : memref<16x32xf32, #tpu.memory_space<vmem>>, vector<8x16xf32>
    tpu.vector_store %arg20[%c0_100, %c0_101], %260 {strides = array<i32>} : memref<16x32xf32, #tpu.memory_space<vmem>>, vector<8x16xf32>,
    %262 = vector.extract_strided_slice %258 {offsets = [1, 0, 0], sizes = [1, 8, 16], strides = [1, 1, 1]} : vector<4x8x16xf32> to vector<1x8x16xf32>
    %263 = vector.shape_cast %262 : vector<1x8x16xf32> to vector<8x16xf32>
    %c0_102 = arith.constant 0 : index
    %c16_103 = arith.constant 16 : index
    %264 = vector.load %arg20[%c0_102, %c16_103] : memref<16x32xf32, #tpu.memory_space<vmem>>, vector<8x16xf32>
    tpu.vector_store %arg20[%c0_102, %c16_103], %263 {strides = array<i32>} : memref<16x32xf32, #tpu.memory_space<vmem>>, vector<8x16xf32>,
    %265 = vector.extract_strided_slice %258 {offsets = [2, 0, 0], sizes = [1, 8, 16], strides = [1, 1, 1]} : vector<4x8x16xf32> to vector<1x8x16xf32>
    %266 = vector.shape_cast %265 : vector<1x8x16xf32> to vector<8x16xf32>
    %c8_104 = arith.constant 8 : index
    %c0_105 = arith.constant 0 : index
    %267 = vector.load %arg20[%c8_104, %c0_105] : memref<16x32xf32, #tpu.memory_space<vmem>>, vector<8x16xf32>
    tpu.vector_store %arg20[%c8_104, %c0_105], %266 {strides = array<i32>} : memref<16x32xf32, #tpu.memory_space<vmem>>, vector<8x16xf32>,
    %268 = vector.extract_strided_slice %258 {offsets = [3, 0, 0], sizes = [1, 8, 16], strides = [1, 1, 1]} : vector<4x8x16xf32> to vector<1x8x16xf32>
    %269 = vector.shape_cast %268 : vector<1x8x16xf32> to vector<8x16xf32>
    %c8_106 = arith.constant 8 : index
    %c16_107 = arith.constant 16 : index
    %270 = vector.load %arg20[%c8_106, %c16_107] : memref<16x32xf32, #tpu.memory_space<vmem>>, vector<8x16xf32>
    tpu.vector_store %arg20[%c8_106, %c16_107], %269 {strides = array<i32>} : memref<16x32xf32, #tpu.memory_space<vmem>>, vector<8x16xf32>,
    %c0_108 = arith.constant 0 : index
    %c0_109 = arith.constant 0 : index
    %271 = vector.load %arg20[%c0_108, %c0_109] : memref<16x32xf32, #tpu.memory_space<vmem>>, vector<16x32xf32>
    %c1_110 = arith.constant 1 : index
    %c0_111 = arith.constant 0 : index
    %c0_112 = arith.constant 0 : index
    %272 = vector.load %arg9[%c1_110, %c0_111, %c0_112] : memref<2x32x32xf32, #tpu.memory_space<vmem>>, vector<1x32x32xf32>
    %273 = vector.shape_cast %272 : vector<1x32x32xf32> to vector<32x32xf32>
    %cst_113 = arith.constant dense<0.000000e+00> : vector<16x32xf32>
    %274 = tpu.matmul %271, %273, %cst_113 {dimension_numbers = #tpu.dot_dimension_numbers<[1], [0], [0], [1], [0, 0, 1, 1], [], []>} : vector<16x32xf32>, vector<32x32xf32>, vector<16x32xf32> -> vector<16x32xf32>
    %c1_114 = arith.constant 1 : index
    %c0_115 = arith.constant 0 : index
    %c0_116 = arith.constant 0 : index
    %275 = vector.load %arg10[%c1_114, %c0_115, %c0_116] : memref<2x1x32xf32, #tpu.memory_space<vmem>>, vector<1x1x32xf32>
    %276 = vector.shape_cast %275 : vector<1x1x32xf32> to vector<1x32xf32>
    %277 = vector.broadcast %276 : vector<1x32xf32> to vector<16x32xf32>
    %278 = arith.addf %274, %277 : vector<16x32xf32>
    %279 = arith.addf %206, %278 : vector<16x32xf32>
    %c1_117 = arith.constant 1 : index
    %c0_118 = arith.constant 0 : index
    %c0_119 = arith.constant 0 : index
    %280 = vector.load %arg11[%c1_117, %c0_118, %c0_119] : memref<2x1x32xf32, #tpu.memory_space<vmem>>, vector<1x1x32xf32>
    %281 = vector.shape_cast %280 : vector<1x1x32xf32> to vector<1x32xf32>
    %c1_120 = arith.constant 1 : index
    %c0_121 = arith.constant 0 : index
    %c0_122 = arith.constant 0 : index
    %282 = vector.load %arg12[%c1_120, %c0_121, %c0_122] : memref<2x1x32xf32, #tpu.memory_space<vmem>>, vector<1x1x32xf32>
    %283 = vector.shape_cast %282 : vector<1x1x32xf32> to vector<1x32xf32>
    %cst_123 = arith.constant dense<0.000000e+00> : vector<16xf32>
    %284 = vector.multi_reduction <add>, %279, %cst_123 [1] : vector<16x32xf32> to vector<16xf32>
    %285 = vector.shape_cast %284 : vector<16xf32> to vector<16x1xf32>
    %cst_124 = arith.constant 3.200000e+01 : f32
    %286 = vector.broadcast %cst_124 : f32 to vector<16x1xf32>
    %287 = arith.divf %285, %286 : vector<16x1xf32>
    %288 = vector.broadcast %287 : vector<16x1xf32> to vector<16x32xf32>
    %289 = arith.subf %279, %288 : vector<16x32xf32>
    %290 = arith.mulf %289, %289 : vector<16x32xf32>
    %cst_125 = arith.constant dense<0.000000e+00> : vector<16xf32>
    %291 = vector.multi_reduction <add>, %290, %cst_125 [1] : vector<16x32xf32> to vector<16xf32>
    %292 = vector.shape_cast %291 : vector<16xf32> to vector<16x1xf32>
    %cst_126 = arith.constant 3.200000e+01 : f32
    %293 = vector.broadcast %cst_126 : f32 to vector<16x1xf32>
    %294 = arith.divf %292, %293 : vector<16x1xf32>
    %295 = vector.broadcast %287 : vector<16x1xf32> to vector<16x32xf32>
    %296 = arith.subf %279, %295 : vector<16x32xf32>
    %cst_127 = arith.constant 9.99999996E-13 : f32
    %297 = vector.broadcast %cst_127 : f32 to vector<16x1xf32>
    %298 = arith.addf %294, %297 : vector<16x1xf32>
    %299 = math.rsqrt %298 : vector<16x1xf32>
    %300 = vector.broadcast %299 : vector<16x1xf32> to vector<16x32xf32>
    %301 = arith.mulf %296, %300 : vector<16x32xf32>
    %302 = vector.broadcast %281 : vector<1x32xf32> to vector<16x32xf32>
    %303 = arith.mulf %301, %302 : vector<16x32xf32>
    %304 = vector.broadcast %283 : vector<1x32xf32> to vector<16x32xf32>
    %305 = arith.addf %303, %304 : vector<16x32xf32>
    %c1_128 = arith.constant 1 : index
    %c0_129 = arith.constant 0 : index
    %c0_130 = arith.constant 0 : index
    %306 = vector.load %arg13[%c1_128, %c0_129, %c0_130] : memref<2x32x64xf32, #tpu.memory_space<vmem>>, vector<1x32x64xf32>
    %307 = vector.shape_cast %306 : vector<1x32x64xf32> to vector<32x64xf32>
    %cst_131 = arith.constant dense<0.000000e+00> : vector<16x64xf32>
    %308 = tpu.matmul %305, %307, %cst_131 {dimension_numbers = #tpu.dot_dimension_numbers<[1], [0], [0], [1], [0, 0, 1, 1], [], []>} : vector<16x32xf32>, vector<32x64xf32>, vector<16x64xf32> -> vector<16x64xf32>
    %c1_132 = arith.constant 1 : index
    %c0_133 = arith.constant 0 : index
    %c0_134 = arith.constant 0 : index
    %309 = vector.load %arg14[%c1_132, %c0_133, %c0_134] : memref<2x1x64xf32, #tpu.memory_space<vmem>>, vector<1x1x64xf32>
    %310 = vector.shape_cast %309 : vector<1x1x64xf32> to vector<1x64xf32>
    %311 = vector.broadcast %310 : vector<1x64xf32> to vector<16x64xf32>
    %312 = arith.addf %308, %311 : vector<16x64xf32>
    %313 = arith.mulf %312, %312 : vector<16x64xf32>
    %314 = arith.mulf %312, %313 : vector<16x64xf32>
    %cst_135 = arith.constant 4.471500e-02 : f32
    %315 = vector.broadcast %cst_135 : f32 to vector<16x64xf32>
    %316 = arith.mulf %315, %314 : vector<16x64xf32>
    %317 = arith.addf %312, %316 : vector<16x64xf32>
    %cst_136 = arith.constant 0.797884583 : f32
    %318 = vector.broadcast %cst_136 : f32 to vector<16x64xf32>
    %319 = arith.mulf %318, %317 : vector<16x64xf32>
    %320 = math.tanh %319 : vector<16x64xf32>
    %cst_137 = arith.constant 1.000000e+00 : f32
    %321 = vector.broadcast %cst_137 : f32 to vector<16x64xf32>
    %322 = arith.addf %321, %320 : vector<16x64xf32>
    %cst_138 = arith.constant 5.000000e-01 : f32
    %323 = vector.broadcast %cst_138 : f32 to vector<16x64xf32>
    %324 = arith.mulf %323, %322 : vector<16x64xf32>
    %325 = arith.mulf %312, %324 : vector<16x64xf32>
    %c1_139 = arith.constant 1 : index
    %c0_140 = arith.constant 0 : index
    %c0_141 = arith.constant 0 : index
    %326 = vector.load %arg15[%c1_139, %c0_140, %c0_141] : memref<2x64x32xf32, #tpu.memory_space<vmem>>, vector<1x64x32xf32>
    %327 = vector.shape_cast %326 : vector<1x64x32xf32> to vector<64x32xf32>
    %cst_142 = arith.constant dense<0.000000e+00> : vector<16x32xf32>
    %328 = tpu.matmul %325, %327, %cst_142 {dimension_numbers = #tpu.dot_dimension_numbers<[1], [0], [0], [1], [0, 0, 1, 1], [], []>} : vector<16x64xf32>, vector<64x32xf32>, vector<16x32xf32> -> vector<16x32xf32>
    %c1_143 = arith.constant 1 : index
    %c0_144 = arith.constant 0 : index
    %c0_145 = arith.constant 0 : index
    %329 = vector.load %arg16[%c1_143, %c0_144, %c0_145] : memref<2x1x32xf32, #tpu.memory_space<vmem>>, vector<1x1x32xf32>
    %330 = vector.shape_cast %329 : vector<1x1x32xf32> to vector<1x32xf32>
    %331 = vector.broadcast %330 : vector<1x32xf32> to vector<16x32xf32>
    %332 = arith.addf %328, %331 : vector<16x32xf32>
    %333 = arith.addf %305, %332 : vector<16x32xf32>
    %c1_146 = arith.constant 1 : index
    %c0_147 = arith.constant 0 : index
    %c0_148 = arith.constant 0 : index
    %334 = vector.load %arg17[%c1_146, %c0_147, %c0_148] : memref<2x1x32xf32, #tpu.memory_space<vmem>>, vector<1x1x32xf32>
    %335 = vector.shape_cast %334 : vector<1x1x32xf32> to vector<1x32xf32>
    %c1_149 = arith.constant 1 : index
    %c0_150 = arith.constant 0 : index
    %c0_151 = arith.constant 0 : index
    %336 = vector.load %arg18[%c1_149, %c0_150, %c0_151] : memref<2x1x32xf32, #tpu.memory_space<vmem>>, vector<1x1x32xf32>
    %337 = vector.shape_cast %336 : vector<1x1x32xf32> to vector<1x32xf32>
    %cst_152 = arith.constant dense<0.000000e+00> : vector<16xf32>
    %338 = vector.multi_reduction <add>, %333, %cst_152 [1] : vector<16x32xf32> to vector<16xf32>
    %339 = vector.shape_cast %338 : vector<16xf32> to vector<16x1xf32>
    %cst_153 = arith.constant 3.200000e+01 : f32
    %340 = vector.broadcast %cst_153 : f32 to vector<16x1xf32>
    %341 = arith.divf %339, %340 : vector<16x1xf32>
    %342 = vector.broadcast %341 : vector<16x1xf32> to vector<16x32xf32>
    %343 = arith.subf %333, %342 : vector<16x32xf32>
    %344 = arith.mulf %343, %343 : vector<16x32xf32>
    %cst_154 = arith.constant dense<0.000000e+00> : vector<16xf32>
    %345 = vector.multi_reduction <add>, %344, %cst_154 [1] : vector<16x32xf32> to vector<16xf32>
    %346 = vector.shape_cast %345 : vector<16xf32> to vector<16x1xf32>
    %cst_155 = arith.constant 3.200000e+01 : f32
    %347 = vector.broadcast %cst_155 : f32 to vector<16x1xf32>
    %348 = arith.divf %346, %347 : vector<16x1xf32>
    %349 = vector.broadcast %341 : vector<16x1xf32> to vector<16x32xf32>
    %350 = arith.subf %333, %349 : vector<16x32xf32>
    %cst_156 = arith.constant 9.99999996E-13 : f32
    %351 = vector.broadcast %cst_156 : f32 to vector<16x1xf32>
    %352 = arith.addf %348, %351 : vector<16x1xf32>
    %353 = math.rsqrt %352 : vector<16x1xf32>
    %354 = vector.broadcast %353 : vector<16x1xf32> to vector<16x32xf32>
    %355 = arith.mulf %350, %354 : vector<16x32xf32>
    %356 = vector.broadcast %335 : vector<1x32xf32> to vector<16x32xf32>
    %357 = arith.mulf %355, %356 : vector<16x32xf32>
    %358 = vector.broadcast %337 : vector<1x32xf32> to vector<16x32xf32>
    %359 = arith.addf %357, %358 : vector<16x32xf32>
    %360 = vector.extract_strided_slice %206 {offsets = [0, 0], sizes = [8, 32], strides = [1, 1]} : vector<16x32xf32> to vector<8x32xf32>
    %cst_157 = arith.constant dense<0.000000e+00> : vector<32xf32>
    %361 = vector.multi_reduction <add>, %360, %cst_157 [0] : vector<8x32xf32> to vector<32xf32>
    %362 = vector.shape_cast %361 : vector<32xf32> to vector<1x32xf32>
    %cst_158 = arith.constant 8.000000e+00 : f32
    %363 = vector.broadcast %cst_158 : f32 to vector<1x32xf32>
    %364 = arith.divf %362, %363 : vector<1x32xf32>
    %365 = vector.extract_strided_slice %359 {offsets = [0, 0], sizes = [8, 32], strides = [1, 1]} : vector<16x32xf32> to vector<8x32xf32>
    %cst_159 = arith.constant dense<0.000000e+00> : vector<32xf32>
    %366 = vector.multi_reduction <add>, %365, %cst_159 [0] : vector<8x32xf32> to vector<32xf32>
    %367 = vector.shape_cast %366 : vector<32xf32> to vector<1x32xf32>
    %cst_160 = arith.constant 8.000000e+00 : f32
    %368 = vector.broadcast %cst_160 : f32 to vector<1x32xf32>
    %369 = arith.divf %367, %368 : vector<1x32xf32>
    %370 = arith.addf %364, %369 : vector<1x32xf32>
    %cst_161 = arith.constant 5.000000e-01 : f32
    %371 = vector.broadcast %cst_161 : f32 to vector<1x32xf32>
    %372 = arith.mulf %371, %370 : vector<1x32xf32>
    %c0_162 = arith.constant 0 : index
    %c0_163 = arith.constant 0 : index
    %373 = vector.load %arg19[%c0_162, %c0_163] : memref<2x32xf32, #tpu.memory_space<vmem>>, vector<1x32xf32>
    tpu.vector_store %arg19[%c0_162, %c0_163], %372 {strides = array<i32>} : memref<2x32xf32, #tpu.memory_space<vmem>>, vector<1x32xf32>,
    %374 = vector.extract_strided_slice %206 {offsets = [8, 0], sizes = [8, 32], strides = [1, 1]} : vector<16x32xf32> to vector<8x32xf32>
    %cst_164 = arith.constant dense<0.000000e+00> : vector<32xf32>
    %375 = vector.multi_reduction <add>, %374, %cst_164 [0] : vector<8x32xf32> to vector<32xf32>
    %376 = vector.shape_cast %375 : vector<32xf32> to vector<1x32xf32>
    %cst_165 = arith.constant 8.000000e+00 : f32
    %377 = vector.broadcast %cst_165 : f32 to vector<1x32xf32>
    %378 = arith.divf %376, %377 : vector<1x32xf32>
    %379 = vector.extract_strided_slice %359 {offsets = [8, 0], sizes = [8, 32], strides = [1, 1]} : vector<16x32xf32> to vector<8x32xf32>
    %cst_166 = arith.constant dense<0.000000e+00> : vector<32xf32>
    %380 = vector.multi_reduction <add>, %379, %cst_166 [0] : vector<8x32xf32> to vector<32xf32>
    %381 = vector.shape_cast %380 : vector<32xf32> to vector<1x32xf32>
    %cst_167 = arith.constant 8.000000e+00 : f32
    %382 = vector.broadcast %cst_167 : f32 to vector<1x32xf32>
    %383 = arith.divf %381, %382 : vector<1x32xf32>
    %384 = arith.addf %378, %383 : vector<1x32xf32>
    %cst_168 = arith.constant 5.000000e-01 : f32
    %385 = vector.broadcast %cst_168 : f32 to vector<1x32xf32>
    %386 = arith.mulf %385, %384 : vector<1x32xf32>
    %c1_169 = arith.constant 1 : index
    %c0_170 = arith.constant 0 : index
    %387 = vector.load %arg19[%c1_169, %c0_170] : memref<2x32xf32, #tpu.memory_space<vmem>>, vector<1x32xf32>
    tpu.vector_store %arg19[%c1_169, %c0_170], %386 {strides = array<i32>} : memref<2x32xf32, #tpu.memory_space<vmem>>, vector<1x32xf32>,
    return
  }
}

</mosaic_0001>

<bundles_post_ra>
// kernel: model_forward.1
= control target key start
LH: loop header
LB: loop body
LE: loop exit
PB: predicated region body
PF: predicated region fallthrough
CT: control target
= control target key end

     0   :  { %s2271_s0 = inlined_call_operand.vmem [shape: s32[16,1], index: 0, kind: input, shape index: {}]   ;;  %s2272_s1 = inlined_call_operand.vmem [shape: s32[2,8], index: 1, kind: input, shape index: {}]   ;;  %s2273_s2 = inlined_call_operand.vmem [shape: f32[100,32], index: 2, kind: input, shape index: {}]   ;;  %s2274_s3 = inlined_call_operand.vmem [shape: f32[16,32], index: 3, kind: input, shape index: {}]   ;;  %s2275_s4 = inlined_call_operand.vmem [shape: f32[2,32], index: 4, kind: input, shape index: {}]   ;;  %s2276_s5 = inlined_call_operand.vmem [shape: f32[1,32], index: 5, kind: input, shape index: {}]   ;;  %s2277_s6 = inlined_call_operand.vmem [shape: f32[1,32], index: 6, kind: input, shape index: {}]   ;;  %s2278_s7 = inlined_call_operand.vmem [shape: f32[2,32,96], index: 7, kind: input, shape index: {}]   ;;  %s2279_s8 = inlined_call_operand.vmem [shape: f32[2,1,96], index: 8, kind: input, shape index: {}]   ;;  %s2280_s9 = inlined_call_operand.vmem [shape: f32[2,32,32], index: 9, kind: input, shape index: {}]   ;;  %s2281_s10 = inlined_call_operand.vmem [shape: f32[2,1,32], index: 10, kind: input, shape index: {}]   ;;  %s2282_s11 = inlined_call_operand.vmem [shape: f32[2,1,32], index: 11, kind: input, shape index: {}]   ;;  %s2283_s12 = inlined_call_operand.vmem [shape: f32[2,1,32], index: 12, kind: input, shape index: {}]   ;;  %s2284_s13 = inlined_call_operand.vmem [shape: f32[2,32,64], index: 13, kind: input, shape index: {}]   ;;  %s2285_s14 = inlined_call_operand.vmem [shape: f32[2,1,64], index: 14, kind: input, shape index: {}]   ;;  %s2286_s15 = inlined_call_operand.vmem [shape: f32[2,64,32], index: 15, kind: input, shape index: {}]   ;;  %s2287_s16 = inlined_call_operand.vmem [shape: f32[2,1,32], index: 16, kind: input, shape index: {}]   ;;  %s2288_s17 = inlined_call_operand.vmem [shape: f32[2,1,32], index: 17, kind: input, shape index: {}]   ;;  %s2289_s18 = inlined_call_operand.vmem [shape: f32[2,1,32], index: 18, kind: input, shape index: {}]   ;;  %s2290_s19 = inlined_call_operand.hbm [shape: f32[2,32], index: 19, kind: output, shape index: {}]  }
   0x1   :  { %2294 = sst [smem:[#allocation6_spill]] %s2271_s0 }
   0x2   :  { %2295 = sst [smem:[#allocation7_spill]] %s2272_s1 }
   0x3   :  { %2296 = sst [smem:[#allocation8_spill]] %s2273_s2 }
   0x4   :  { %2297 = sst [smem:[#allocation9_spill]] %s2274_s3 }
   0x5   :  { %2298 = sst [smem:[#allocation10_spill]] %s2285_s14 }
   0x6   :  { %s2299_s20 = sld [smem:[#allocation6_spill]]  ;;  %vm98_vm0 = vcmask 1043456   ;;  %v1721_v2 = vmov 0  }
   0x7   :  { %s2300_s14 = sld [smem:[#allocation8_spill]]  ;;  %1596 = vset.pattern.permute.xlu0 %v1721_v2 }
   0xc   :  { %v63_v0 = vld [vmem:[%s2299_s20] sm:$0xff]  ;;  %v64_v7 = vld [vmem:[%s2299_s20 + $0x8] sm:$0xff] }
   0xd   :  { %v89_v1 = vld [vmem:[%s2300_s14 + $0x60] sm:$0xf]  ;;  %v88_v3 = vld [vmem:[%s2300_s14 + $0x58] sm:$0xff]  ;;  %68 = vperm.xlu0 %1596, %v63_v0   ;;  %v87_v4 = vld [vmem:[%s2300_s14 + $0x50] sm:$0xff] }
   0xe   :  { %1516 = vmatpush.msk.msra.mxu0 %vm98_vm0, %v89_v1  ;;  %v86_v5 = vld [vmem:[%s2300_s14 + $0x48] sm:$0xff]  ;;  %v85_v6 = vld [vmem:[%s2300_s14 + $0x40] sm:$0xff]  ;;  %v84_v8 = vld [vmem:[%s2300_s14 + $0x38] sm:$0xff] }
   0xf   :  { %v83_v9 = vld [vmem:[%s2300_s14 + $0x30] sm:$0xff] }
  0x10   :  { %106 = vmatpush.msra.mxu0 %v88_v3 }
  0x12   :  { %107 = vmatpush.msra.mxu0 %v87_v4 }
  0x14   :  { %108 = vmatpush.msra.mxu0 %v86_v5 }
  0x15   :  { %71 = vperm.xlu0 %1596, %v64_v7  }
  0x16   :  { %109 = vmatpush.msra.mxu0 %v85_v6 }
  0x18   :  { %110 = vmatpush.msra.mxu0 %v84_v8 }
  0x19   :  { %24 = vsyncpa [#allocation4], 0  ;;  %v82_v10 = vld [vmem:[%s2300_s14 + $0x28] sm:$0xff]  ;;  %v81_v11 = vld [vmem:[%s2300_s14 + $0x20] sm:$0xff]  ;;  %v65_v16 = vlaneseq  ;;  %vm91_vm1 = vcmask 818176   ;;  %v1722_v19 = vmov 0.0  }
  0x1a   :  { %111 = vmatpush.msra.mxu0 %v83_v9  ;;  %v80_v12 = vld [vmem:[%s2300_s14 + $0x18] sm:$0xff]  ;;  %v79_v13 = vld [vmem:[%s2300_s14 + $0x10] sm:$0xff]  ;;  %v78_v14 = vld [vmem:[%s2300_s14 + $0x8] sm:$0xff]  ;;  %s2301_s1 = sld [smem:[#allocation9_spill]]  ;;  %vm131_vm4 = vcmask 261120   ;;  %v1723_v33 = vmov 32.0  }
  0x1b   :  { %v77_v15 = vld [vmem:[%s2300_s14] sm:$0xff]  ;;  %v66_v17 = vand.u32 127, %v65_v16  ;;  %1631 = vrcp.f32 %v1723_v33  ;;  %v203_v50 = vld [vmem:[%s2278_s7 + $0x18] sm:$0xff]  ;;  %v202_v51 = vld [vmem:[%s2278_s7 + $0x10] sm:$0xff]  ;;  %s1724_s30 = smov 112   ;;  %s1725_s21 = smov 96  }
  0x1c   :  { %112 = vmatpush.msra.mxu0 %v82_v10  ;;  %v1612_v24 = vld [vmem:[%s2275_s4] ss:$0 sm:$0xff]  ;;  %226 = vmatpush.msra.mxu1 %v203_v50  ;;  %v201_v52 = vld [vmem:[%s2278_s7 + $0x8] sm:$0xff]  ;;  %vm245_vm12 = vcmask 130048   ;;  %s2302_s2 = sld [smem:[#allocation7_spill]]  ;;  %vm358_vm13 = vcmask 64512  }
  0x1d   :  { %v200_v53 = vld [vmem:[%s2278_s7] sm:$0xff]  ;;  %s1726_s4 = smov 64   ;;  %s1727_s14 = smov 16  }
  0x1e   :  { %113 = vmatpush.msra.mxu0 %v81_v11  ;;  %227 = vmatpush.msra.mxu1 %v202_v51  ;;  %v1613_v4 = vld [vmem:[%s2276_s5] ss:$0 sm:$0xff]  ;;  %s2303_s5 = sld [smem:[#allocation10_spill]]  ;;  %s1507_s29 = sshll.u32 %s2290_s19, 4  ;;  %s1508_s29 = int_to_ptr.hbm [resolvable:$true] %s1507_s29 }
  0x1f   :  { %v1614_v8 = vld [vmem:[%s2277_s6] ss:$0 sm:$0xff] }
  0x20   :  { %114 = vmatpush.msra.mxu0 %v80_v12  ;;  %v90_v23 = vld [vmem:[%s2301_s1] sm:$0xff]  ;;  %228 = vmatpush.msra.mxu1 %v201_v52 }
  0x21   :  { %v1632_v34 = vpop.eup %1631 }
  0x22   :  { %115 = vmatpush.msra.mxu0 %v79_v13  ;;  %v139_v35 = vmul.f32 32.0, %v1632_v34  ;;  %vm143_vm5 = vweird.f32 %v1632_v34  ;;  %229 = vmatpush.msra.mxu1 %v200_v53 }
  0x24   :  { %116 = vmatpush.msra.mxu0 %v78_v14  ;;  %v140_v36 = vsub.f32 1.0, %v139_v35 }
  0x26   :  { %117 = vmatpush.msra.mxu0 %v77_v15  ;;  %v141_v37 = vmul.f32 %v1632_v34, %v140_v36 }
  0x28   :  { %v142_v38 = vadd.f32 %v1632_v34, %v141_v37 }
  0x2a   :  { %v1883_v39 = vsel %vm143_vm5, %v1632_v34, %v142_v38 }
  0x7f   :  { %v69_v18 = vpop.permute.xlu0 %68 }
  0x80   :  { %vm73_vm2 = vcmp.eq.s32.totalorder %v66_v17, %v69_v18  ;;  %v1615_v18 = vld [vmem:[%s2279_s8] ss:$0 sm:$0xff] }
  0x81   :  { %v75_v20 = vsel %vm73_vm2, 1.0, %v1722_v19 }
  0x82   :  { %1517 = vmatmul.msk.f32.vlgmr.msra.gmra.mxu0 %vm91_vm1, %v75_v20 }
  0x87   :  { %v72_v21 = vpop.permute.xlu0 %71 }
  0x88   :  { %vm74_vm3 = vcmp.eq.s32.totalorder %v66_v17, %v72_v21 }
  0x89   :  { %v76_v22 = vsel %vm74_vm3, 1.0, %v1722_v19 }
  0x8a   :  { %1518 = vmatmul.msk.f32.gmra.mxu0 %vm91_vm1, %v76_v22 }
  0xff   :  { %v119_v25 = vpop.f32.mrf.mxu0 }
 0x100   :  { %v120_v26 = vadd.f32 %v119_v25, %v90_v23 }
 0x102   :  { %v127_v27 = vadd.f32 %v1612_v24, %v120_v26  ;;  %v193_v26 = vld [vmem:[%s2302_s2] sm:$0x3] }
 0x104   :  { %v132_v28 = vsel %vm131_vm4, %v127_v27, 0.0 }
 0x105   :  { %133 = vadd.xlane.f32.xlu1 %v132_v28 }
 0x107   :  { %v122_v29 = vpop.f32.mrf.mxu0 }
 0x108   :  { %v123_v30 = vadd.f32 %v122_v29, %v90_v23 }
 0x10a   :  { %v128_v31 = vadd.f32 %v1612_v24, %v123_v30 }
 0x10c   :  { %v135_v32 = vsel %vm131_vm4, %v128_v31, 0.0 }
 0x10d   :  { %136 = vadd.xlane.f32.xlu1 %v135_v32 }
 0x178   :  { %v134_v40 = vpop.xlane.xlu1 %133 }
 0x179   :  { %v145_v41 = vmul.f32 %v1883_v39, %v134_v40 }
 0x17b   :  { %v147_v42 = vsub.f32 %v127_v27, %v145_v41  ;;  %v194_v27 = vcvt.s32.f32 %v193_v26 }
 0x17d   :  { %v149_v43 = vmul.f32 %v147_v42, %v147_v42  ;;  %v195_v28 = vsub.f32 1.0, %v194_v27 }
 0x17f   :  { %v151_v44 = vsel %vm131_vm4, %v149_v43, 0.0  ;;  %v196_v29 = vmul.f32 -1e+09, %v195_v28 }
 0x180   :  { %152 = vadd.xlane.f32.xlu2 %v151_v44  ;;  %v137_v45 = vpop.xlane.xlu1 %136 }
 0x181   :  { %v146_v46 = vmul.f32 %v1883_v39, %v137_v45  ;;  %v1943_v30 = vperm.slane %v196_v29, 0  ;;  %v198_v45 = vrot.slane %v196_v29, 1 }
 0x183   :  { %v148_v47 = vsub.f32 %v128_v31, %v146_v46 }
 0x185   :  { %v150_v48 = vmul.f32 %v148_v47, %v148_v47 }
 0x187   :  { %v154_v49 = vsel %vm131_vm4, %v150_v48, 0.0 }
 0x188   :  { %155 = vadd.xlane.f32.xlu2 %v154_v49 }
 0x1f3   :  { %v153_v54 = vpop.xlane.xlu2 %152 }
 0x1f4   :  { %v157_v55 = vmul.f32 %v153_v54, %v1883_v39 }
 0x1f6   :  { %v159_v56 = vadd.f32 1e-12, %v157_v55 }
 0x1f8   :  { %1633 = vrsqrt.f32 %v159_v56  ;;  %vm167_vm7 = vweird.f32 %v159_v56 }
 0x1fb   :  { %v156_v57 = vpop.xlane.xlu2 %155 }
 0x1fc   :  { %v158_v58 = vmul.f32 %v156_v57, %v1883_v39 }
 0x1fe   :  { %v1634_v59 = vpop.eup %1633  ;;  %v160_v60 = vadd.f32 1e-12, %v158_v58 }
 0x1ff   :  { %v162_v61 = vmul.f32 %v1634_v59, %v159_v56  ;;  %vm168_vm6 = vweird.f32 %v1634_v59 }
 0x200   :  { %1635 = vrsqrt.f32 %v160_v60  ;;  %vm169_vm8 = vmor %vm167_vm7, %vm168_vm6  ;;  %vm177_vm10 = vweird.f32 %v160_v60 }
 0x201   :  { %v163_v62 = vmul.f32 %v1634_v59, %v162_v61 }
 0x203   :  { %v164_v63 = vmul.f32 0.5, %v163_v62 }
 0x205   :  { %v165_v0 = vsub.f32 1.5, %v164_v63 }
 0x206   :  { %v1636_v1 = vpop.eup %1635 }
 0x207   :  { %v166_v2 = vmul.f32 %v1634_v59, %v165_v0  ;;  %v172_v3 = vmul.f32 %v1636_v1, %v160_v60  ;;  %vm178_vm9 = vweird.f32 %v1636_v1 }
 0x208   :  { %vm179_vm11 = vmor %vm177_vm10, %vm178_vm9 }
 0x209   :  { %v170_v5 = vsel %vm169_vm8, %v1634_v59, %v166_v2  ;;  %v173_v6 = vmul.f32 %v1636_v1, %v172_v3 }
 0x20a   :  { %v181_v7 = vmul.f32 %v170_v5, %v147_v42 }
 0x20b   :  { %v174_v9 = vmul.f32 0.5, %v173_v6 }
 0x20c   :  { %v186_v10 = vmul.f32 %v1613_v4, %v181_v7 }
 0x20d   :  { %v175_v11 = vsub.f32 1.5, %v174_v9 }
 0x20e   :  { %v1909_v12 = vadd.f32 %v1614_v8, %v186_v10 }
 0x20f   :  { %v176_v13 = vmul.f32 %v1636_v1, %v175_v11 }
 0x210   :  { %1519 = vmatmul.msk.f32.vlgmr.msra.gmra.mxu1 %vm131_vm4, %v1909_v12 }
 0x211   :  { %v180_v14 = vsel %vm179_vm11, %v1636_v1, %v176_v13 }
 0x212   :  { %v182_v15 = vmul.f32 %v180_v14, %v148_v47  ;;  %v1957_v47 = vperm.slane %v198_v45, 0 }
 0x214   :  { %v187_v16 = vmul.f32 %v1613_v4, %v182_v15 }
 0x216   :  { %v1913_v17 = vadd.f32 %v1614_v8, %v187_v16 }
 0x218   :  { %1520 = vmatmul.msk.f32.gmra.mxu1 %vm131_vm4, %v1913_v17 }
 0x28d   :  { %v231_v19 = vpop.f32.mrf.mxu1 }
 0x28e   :  { %v1920_v20 = vadd.f32 %v1615_v18, %v231_v19 }
 0x290   :  { %238 = vrot.lane.b32.xlu0 %v1920_v20, %s1724_s30  ;;  %243 = vrot.lane.b32.xlu2 %v1920_v20, %s1725_s21 }
 0x295   :  { %v234_v21 = vpop.f32.mrf.mxu1 }
 0x296   :  { %v1926_v22 = vadd.f32 %v1615_v18, %v234_v21 }
 0x298   :  { %241 = vrot.lane.b32.xlu1 %v1926_v22, %s1724_s30 }
 0x2ea   :  { %v244_v23 = vpop.permute.xlu2 %243 }
 0x2eb   :  { %1521 = vmatpush.xpose.msk.msra.mxu3 %vm245_vm12, %v244_v23 }
 0x2ee   :  { %1522 = vmatmul.msk.f32.vlgmr.msra.gmra.mxu3 %vm245_vm12, %v1920_v20 }
 0x302   :  { %v239_v24 = vpop.permute.xlu0 %238 }
 0x303   :  { %270 = vrot.lane.b32.xlu0 %v239_v24, %s1725_s21  ;;  %v1597_v58 = vpack.i.bf16 %v239_v24, %v1920_v20 }
 0x30a   :  { %v1934_v25 = vpop.permute.xlu1 %241 }
 0x30b   :  { %322 = vrot.lane.b32.xlu0 %v1934_v25, %s1725_s21 }
 0x313   :  { %296 = vrot.lane.b32.xlu0 %v1926_v22, %s1725_s21 }
 0x371   :  { %v267_v31 = vpop.f32.mrf.mxu3 }
 0x372   :  { %v348_v32 = vmul.f32 0.25, %v267_v31 }
 0x374   :  { %v354_v33 = vadd.f32 %v1943_v30, %v348_v32 }
 0x375   :  { %v271_v34 = vpop.permute.xlu0 %270 }
 0x376   :  { %1523 = vmatpush.xpose.msk.msrb.mxu3 %vm245_vm12, %v271_v34  ;;  %v359_v35 = vsel %vm358_vm13, %v354_v33, -inf }
 0x377   :  { %360 = vmax.xlane.f32.xlu2 %v359_v35 }
 0x379   :  { %1524 = vmatmul.msk.f32.vlgmr.msrb.gmra.mxu3 %vm245_vm12, %v239_v24 }
 0x37d   :  { %v323_v36 = vpop.permute.xlu0 %322 }
 0x37e   :  { %1527 = vmatpush.xpose.msk.msra.mxu3 %vm245_vm12, %v323_v36 }
 0x381   :  { %1528 = vmatmul.msk.f32.vlgmr.msra.gmra.mxu3 %vm245_vm12, %v1934_v25 }
 0x385   :  { %v297_v37 = vpop.permute.xlu0 %296 }
 0x386   :  { %1525 = vmatpush.xpose.msk.msra.mxu2 %vm245_vm12, %v297_v37 }
 0x389   :  { %1526 = vmatmul.msk.f32.vlgmr.msra.gmra.mxu2 %vm245_vm12, %v1926_v22 }
 0x3ea   :  { %v361_v38 = vpop.xlane.xlu2 %360 }
 0x3eb   :  { %v371_v40 = vsub.f32 %v354_v33, %v361_v38 }
 0x3ed   :  { %v375_v41 = vmul.f32 1.442695, %v371_v40 }
 0x3ef   :  { %1637 = vpow2.f32 %v375_v41 }
 0x3f5   :  { %v1638_v50 = vpop.eup %1637 }
 0x3f6   :  { %v383_v52 = vsel %vm358_vm13, %v1638_v50, 0.0 }
 0x3fc   :  { %v293_v42 = vpop.f32.mrf.mxu3 }
 0x3fd   :  { %v349_v43 = vmul.f32 0.25, %v293_v42 }
 0x3ff   :  { %v355_v44 = vadd.f32 %v1943_v30, %v349_v43 }
 0x401   :  { %v362_v46 = vsel %vm358_vm13, %v355_v44, -inf }
 0x402   :  { %363 = vmax.xlane.f32.xlu1 %v362_v46 }
 0x404   :  { %v345_v48 = vpop.f32.mrf.mxu3 }
 0x405   :  { %v351_v49 = vmul.f32 0.25, %v345_v48 }
 0x407   :  { %v357_v51 = vadd.f32 %v1957_v47, %v351_v49 }
 0x409   :  { %v368_v53 = vsel %vm358_vm13, %v357_v51, -inf }
 0x40a   :  { %384 = vadd.xlane.f32.xlu1 %v383_v52  ;;  %369 = vmax.xlane.f32.xlu0 %v368_v53 }
 0x40c   :  { %v319_v54 = vpop.f32.mrf.mxu2 }
 0x40d   :  { %v350_v55 = vmul.f32 0.25, %v319_v54 }
 0x40f   :  { %v356_v56 = vadd.f32 %v1957_v47, %v350_v55 }
 0x411   :  { %v365_v57 = vsel %vm358_vm13, %v356_v56, -inf }
 0x412   :  { %366 = vmax.xlane.f32.xlu2 %v365_v57 }
 0x423   :  { %1598 = vrot.lane.b32.xlu1 %v1597_v58, %s1726_s4 }
 0x475   :  { %v364_v59 = vpop.xlane.xlu1 %363 }
 0x476   :  { %v372_v60 = vsub.f32 %v355_v44, %v364_v59 }
 0x478   :  { %v377_v61 = vmul.f32 1.442695, %v372_v60 }
 0x47a   :  { %1639 = vpow2.f32 %v377_v61 }
 0x47d   :  { %v385_v62 = vpop.xlane.xlu1 %384  ;;  %v370_v63 = vpop.xlane.xlu0 %369 }
 0x47e   :  { %1641 = vrcp.f32 %v385_v62  ;;  %v374_v0 = vsub.f32 %v357_v51, %v370_v63  ;;  %v406_v15 = vand.u32 2147483648, %v385_v62  ;;  %vm400_vm15 = vweird.f32 %v385_v62 }
 0x47f   :  { %v404_v16 = vand.u32 2147483647, %v385_v62 }
 0x480   :  { %v1966_v1 = vpop.eup %1639  ;;  %v381_v2 = vmul.f32 1.442695, %v374_v0  ;;  %v407_v21 = vor.u32 1.1754944e-38, %v406_v15 }
 0x481   :  { %v386_v3 = vsel %vm358_vm13, %v1966_v1, 0.0  ;;  %vm405_vm1 = vcmp.eq.f32.partialorder %v404_v16, 8.507059e+37 }
 0x482   :  { %387 = vadd.xlane.f32.xlu2 %v386_v3  ;;  %1643 = vpow2.f32 %v381_v2 }
 0x484   :  { %v1642_v4 = vpop.eup %1641 }
 0x485   :  { %v396_v5 = vmul.f32 %v1642_v4, %v385_v62  ;;  %v367_v6 = vpop.xlane.xlu2 %366  ;;  %vm401_vm14 = vweird.f32 %v1642_v4 }
 0x486   :  { %v373_v7 = vsub.f32 %v356_v56, %v367_v6  ;;  %vm402_vm0 = vmor %vm400_vm15, %vm401_vm14 }
 0x487   :  { %v397_v8 = vsub.f32 1.0, %v396_v5 }
 0x488   :  { %v379_v9 = vmul.f32 1.442695, %v373_v7  ;;  %v1970_v10 = vpop.eup %1643 }
 0x489   :  { %v398_v11 = vmul.f32 %v1642_v4, %v397_v8  ;;  %v392_v13 = vsel %vm358_vm13, %v1970_v10, 0.0  ;;  %v577_v8 = vld [vmem:[%s2280_s9 + $0x18] sm:$0xff] }
 0x48a   :  { %1645 = vpow2.f32 %v379_v9  ;;  %393 = vadd.xlane.f32.xlu0 %v392_v13  ;;  %v576_v9 = vld [vmem:[%s2280_s9 + $0x10] sm:$0xff] }
 0x48b   :  { %v399_v14 = vadd.f32 %v1642_v4, %v398_v11  ;;  %v574_v11 = vld [vmem:[%s2280_s9] sm:$0xff] }
 0x48d   :  { %v403_v20 = vsel %vm402_vm0, %v1642_v4, %v399_v14 }
 0x48e   :  { %v408_v23 = vsel %vm405_vm1, %v407_v21, %v403_v20  ;;  %vm564_vm1 = vcmask 261248  }
 0x48f   :  { %v409_v28 = vmul.f32 %v1638_v50, %v408_v23 }
 0x490   :  { %v1974_v18 = vpop.eup %1645 }
 0x491   :  { %v389_v19 = vsel %vm358_vm13, %v1974_v18, 0.0 }
 0x492   :  { %390 = vadd.xlane.f32.xlu0 %v389_v19 }
 0x495   :  { %v1599_v24 = vpop.permute.xlu1 %1598 }
 0x496   :  { %v1601_v26 = vunpack.i.h.bf16 %v1599_v24  ;;  %v1600_v27 = vunpack.i.l.bf16 %v1599_v24 }
 0x498   :  { %476 = vmatpush.msrb.mxu2 %v1600_v27  ;;  %502 = vmatpush.msrb.mxu3 %v1601_v26 }
 0x499   :  { %1529 = vmatmul.msk.f32.vlgmr.msrb.gmra.mxu2 %vm358_vm13, %v409_v28 }
 0x49a   :  { %533 = vrot.lane.b32.xlu2 %v1934_v25, %s1726_s4  ;;  %600 = vmatpush.msra.mxu3 %v577_v8  ;;  %v729_v8 = vld [vmem:[%s2286_s15 + $0x28] sm:$0xff] }
 0x49c   :  { %601 = vmatpush.msra.mxu3 %v576_v9  ;;  %v728_v9 = vld [vmem:[%s2286_s15 + $0x20] sm:$0xff] }
 0x4a6   :  { %507 = vrot.lane.b32.xlu0 %v1926_v22, %s1726_s4 }
 0x4f5   :  { %v388_v29 = vpop.xlane.xlu2 %387 }
 0x4f6   :  { %1647 = vrcp.f32 %v388_v29  ;;  %v421_v36 = vand.u32 2147483648, %v388_v29  ;;  %v419_v38 = vand.u32 2147483647, %v388_v29  ;;  %vm415_vm3 = vweird.f32 %v388_v29 }
 0x4f8   :  { %v422_v25 = vor.u32 1.1754944e-38, %v421_v36  ;;  %vm420_vm6 = vcmp.eq.f32.partialorder %v419_v38, 8.507059e+37 }
 0x4fc   :  { %v1648_v31 = vpop.eup %1647 }
 0x4fd   :  { %v411_v32 = vmul.f32 %v1648_v31, %v388_v29  ;;  %v534_v33 = vpop.permute.xlu2 %533  ;;  %v394_v34 = vpop.xlane.xlu0 %393  ;;  %vm416_vm2 = vweird.f32 %v1648_v31 }
 0x4fe   :  { %554 = vmatpush.msra.mxu2 %v534_v33  ;;  %1649 = vrcp.f32 %v394_v34  ;;  %vm417_vm5 = vmor %vm415_vm3, %vm416_vm2  ;;  %v451_v48 = vand.u32 2147483648, %v394_v34  ;;  %v449_v50 = vand.u32 2147483647, %v394_v34  ;;  %vm445_vm8 = vweird.f32 %v394_v34 }
 0x4ff   :  { %v412_v35 = vsub.f32 1.0, %v411_v32 }
 0x500   :  { %v452_v53 = vor.u32 1.1754944e-38, %v451_v48  ;;  %vm450_vm10 = vcmp.eq.f32.partialorder %v449_v50, 8.507059e+37 }
 0x501   :  { %v413_v37 = vmul.f32 %v1648_v31, %v412_v35 }
 0x503   :  { %v414_v40 = vadd.f32 %v1648_v31, %v413_v37 }
 0x504   :  { %v1650_v41 = vpop.eup %1649 }
 0x505   :  { %v418_v42 = vsel %vm417_vm5, %v1648_v31, %v414_v40  ;;  %v441_v43 = vmul.f32 %v1650_v41, %v394_v34  ;;  %v391_v44 = vpop.xlane.xlu0 %390  ;;  %vm446_vm7 = vweird.f32 %v1650_v41  ;;  %v671_v40 = vld [vmem:[%s2284_s13 + $0x10] sm:$0xff] }
 0x506   :  { %v423_v22 = vsel %vm420_vm6, %v422_v25, %v418_v42  ;;  %1651 = vrcp.f32 %v391_v44  ;;  %vm447_vm9 = vmor %vm445_vm8, %vm446_vm7  ;;  %v436_v59 = vand.u32 2147483648, %v391_v44  ;;  %v434_v61 = vand.u32 2147483647, %v391_v44  ;;  %v670_v25 = vld [vmem:[%s2284_s13 + $0x8] sm:$0xff] }
 0x507   :  { %v442_v45 = vsub.f32 1.0, %v441_v43  ;;  %v424_v46 = vmul.f32 %v1966_v1, %v423_v22  ;;  %vm430_vm14 = vweird.f32 %v391_v44 }
 0x508   :  { %v437_v63 = vor.u32 1.1754944e-38, %v436_v59  ;;  %vm435_vm0 = vcmp.eq.f32.partialorder %v434_v61, 8.507059e+37 }
 0x509   :  { %v443_v49 = vmul.f32 %v1650_v41, %v442_v45  ;;  %1530 = vmatmul.msk.f32.vlgmr.msrb.gmra.mxu3 %vm358_vm13, %v424_v46 }
 0x50b   :  { %v444_v51 = vadd.f32 %v1650_v41, %v443_v49 }
 0x50c   :  { %v1652_v52 = vpop.eup %1651 }
 0x50d   :  { %v448_v54 = vsel %vm447_vm9, %v1650_v41, %v444_v51  ;;  %v426_v55 = vmul.f32 %v1652_v52, %v391_v44  ;;  %vm431_vm11 = vweird.f32 %v1652_v52  ;;  %v669_v41 = vld [vmem:[%s2284_s13] sm:$0xff]  ;;  %vm736_vm9 = vcmask 523264  }
 0x50e   :  { %v453_v56 = vsel %vm450_vm10, %v452_v53, %v448_v54  ;;  %vm432_vm15 = vmor %vm430_vm14, %vm431_vm11 }
 0x50f   :  { %v427_v57 = vsub.f32 1.0, %v426_v55  ;;  %v454_v58 = vmul.f32 %v1970_v10, %v453_v56  ;;  %v575_v10 = vld [vmem:[%s2280_s9 + $0x8] sm:$0xff]  ;;  %v1617_v56 = vld [vmem:[%s2282_s11] ss:$0 sm:$0xff] }
 0x510   :  { %602 = vmatpush.msra.mxu3 %v575_v10  ;;  %v727_v10 = vld [vmem:[%s2286_s15 + $0x18] sm:$0xff] }
 0x511   :  { %v428_v60 = vmul.f32 %v1652_v52, %v427_v57  ;;  %1532 = vmatmul.msk.f32.vlgmr.msra.gmra.mxu2 %vm358_vm13, %v454_v58 }
 0x512   :  { %603 = vmatpush.msra.mxu3 %v574_v11  ;;  %v726_v11 = vld [vmem:[%s2286_s15 + $0x10] sm:$0xff] }
 0x513   :  { %v429_v62 = vadd.f32 %v1652_v52, %v428_v60  ;;  %v1618_v60 = vld [vmem:[%s2283_s12] ss:$0 sm:$0xff] }
 0x515   :  { %v433_v0 = vsel %vm432_vm15, %v1652_v52, %v429_v62 }
 0x516   :  { %v438_v1 = vsel %vm435_vm0, %v437_v63, %v433_v0 }
 0x517   :  { %v439_v2 = vmul.f32 %v1974_v18, %v438_v1  ;;  %v1616_v18 = vld [vmem:[%s2281_s10] ss:$0 sm:$0xff] }
 0x518   :  { %v508_v3 = vpop.permute.xlu0 %507 }
 0x519   :  { %528 = vmatpush.msrb.mxu1 %v508_v3 }
 0x51a   :  { %1531 = vmatmul.msk.f32.vlgmr.msrb.gmra.mxu1 %vm358_vm13, %v439_v2 }
 0x51c   :  { %v478_v4 = vpop.f32.mrf.mxu2 }
 0x51d   :  { %559 = vst.msk [vmem:[#allocation2] sm:$0xff] %vm245_vm12, %v478_v4 }
 0x58c   :  { %v504_v5 = vpop.f32.mrf.mxu3 }
 0x58d   :  { %561 = vrot.lane.b32.xlu1 %v504_v5, %s1727_s14 }
 0x594   :  { %v556_v6 = vpop.f32.mrf.mxu2 }
 0x595   :  { %568 = vrot.lane.b32.xlu2 %v556_v6, %s1727_s14  ;;  %v731_v6 = vld [vmem:[%s2286_s15 + $0x38] sm:$0xff] }
 0x596   :  { %751 = vmatpush.msrb.mxu0 %v731_v6 }
 0x597   :  { %v530_v7 = vpop.f32.mrf.mxu1 }
 0x598   :  { %566 = vst.msk [vmem:[#allocation2 + $0x8] sm:$0xff] %vm245_vm12, %v530_v7  ;;  %v730_v7 = vld [vmem:[%s2286_s15 + $0x30] sm:$0xff] }
 0x599   :  { %752 = vmatpush.msrb.mxu0 %v730_v7 }
 0x59b   :  { %753 = vmatpush.msrb.mxu0 %v729_v8 }
 0x59d   :  { %754 = vmatpush.msrb.mxu0 %v728_v9 }
 0x59f   :  { %755 = vmatpush.msrb.mxu0 %v727_v10 }
 0x5a1   :  { %756 = vmatpush.msrb.mxu0 %v726_v11 }
 0x5ef   :  { %v569_v13 = vpop.permute.xlu2 %568 }
 0x5f0   :  { %571 = vst.msk [vmem:[#allocation2 + $0x8] sm:$0xff] %vm564_vm1, %v569_v13  ;;  %v725_v13 = vld [vmem:[%s2286_s15 + $0x8] sm:$0xff] }
 0x5f1   :  { %757 = vmatpush.msrb.mxu0 %v725_v13 }
 0x5f7   :  { %v573_v16 = vld [vmem:[#allocation2 + $0x8] sm:$0xff] }
 0x5ff   :  { %v562_v14 = vpop.permute.xlu1 %561 }
 0x600   :  { %565 = vst.msk [vmem:[#allocation2] sm:$0xff] %vm564_vm1, %v562_v14  ;;  %v724_v14 = vld [vmem:[%s2286_s15] sm:$0xff] }
 0x601   :  { %758 = vmatpush.msrb.mxu0 %v724_v14  ;;  %v1621_v14 = vld [vmem:[%s2288_s17] ss:$0 sm:$0xff] }
 0x607   :  { %v572_v15 = vld [vmem:[#allocation2] sm:$0xff] }
 0x608   :  { %1533 = vmatmul.msk.f32.vlgmr.msra.gmra.mxu3 %vm131_vm4, %v572_v15  ;;  %v1619_v15 = vld [vmem:[%s2303_s5] ss:$0 sm:$0xff] }
 0x610   :  { %1534 = vmatmul.msk.f32.gmra.mxu3 %vm131_vm4, %v573_v16 }
 0x68b   :  { %v605_v19 = vpop.f32.mrf.mxu3 }
 0x68c   :  { %v606_v20 = vadd.f32 %v1616_v18, %v605_v19 }
 0x68e   :  { %v611_v21 = vadd.f32 %v606_v20, %v1909_v12 }
 0x690   :  { %v615_v23 = vsel %vm131_vm4, %v611_v21, 0.0 }
 0x691   :  { %616 = vadd.xlane.f32.xlu1 %v615_v23 }
 0x693   :  { %v608_v24 = vpop.f32.mrf.mxu3 }
 0x694   :  { %v609_v26 = vadd.f32 %v1616_v18, %v608_v24 }
 0x696   :  { %v612_v27 = vadd.f32 %v609_v26, %v1913_v17  ;;  %v672_v17 = vld [vmem:[%s2284_s13 + $0x18] sm:$0xff] }
 0x697   :  { %695 = vmatpush.msra.mxu1 %v672_v17 }
 0x698   :  { %v618_v28 = vsel %vm131_vm4, %v612_v27, 0.0 }
 0x699   :  { %619 = vadd.xlane.f32.xlu0 %v618_v28  ;;  %696 = vmatpush.msra.mxu1 %v671_v40 }
 0x69b   :  { %697 = vmatpush.msra.mxu1 %v670_v25  ;;  %v1620_v25 = vld [vmem:[%s2287_s16] ss:$0 sm:$0xff] }
 0x69d   :  { %698 = vmatpush.msra.mxu1 %v669_v41 }
 0x704   :  { %v617_v29 = vpop.xlane.xlu1 %616 }
 0x705   :  { %v621_v31 = vmul.f32 %v617_v29, %v1883_v39 }
 0x707   :  { %v623_v32 = vsub.f32 %v611_v21, %v621_v31 }
 0x709   :  { %v625_v33 = vmul.f32 %v623_v32, %v623_v32 }
 0x70b   :  { %v627_v34 = vsel %vm131_vm4, %v625_v33, 0.0 }
 0x70c   :  { %628 = vadd.xlane.f32.xlu2 %v627_v34  ;;  %v620_v35 = vpop.xlane.xlu0 %619 }
 0x70d   :  { %v622_v12 = vmul.f32 %v620_v35, %v1883_v39 }
 0x70f   :  { %v624_v36 = vsub.f32 %v612_v27, %v622_v12 }
 0x711   :  { %v626_v37 = vmul.f32 %v624_v36, %v624_v36 }
 0x713   :  { %v630_v38 = vsel %vm131_vm4, %v626_v37, 0.0 }
 0x714   :  { %631 = vadd.xlane.f32.xlu1 %v630_v38 }
 0x77f   :  { %v629_v42 = vpop.xlane.xlu2 %628 }
 0x780   :  { %v633_v22 = vmul.f32 %v629_v42, %v1883_v39 }
 0x782   :  { %v635_v43 = vadd.f32 1e-12, %v633_v22 }
 0x784   :  { %1653 = vrsqrt.f32 %v635_v43  ;;  %vm643_vm3 = vweird.f32 %v635_v43 }
 0x787   :  { %v632_v44 = vpop.xlane.xlu1 %631 }
 0x788   :  { %v634_v45 = vmul.f32 %v632_v44, %v1883_v39 }
 0x78a   :  { %v1654_v46 = vpop.eup %1653  ;;  %v636_v48 = vadd.f32 1e-12, %v634_v45 }
 0x78b   :  { %v638_v49 = vmul.f32 %v1654_v46, %v635_v43  ;;  %vm644_vm2 = vweird.f32 %v1654_v46 }
 0x78c   :  { %1655 = vrsqrt.f32 %v636_v48  ;;  %vm645_vm5 = vmor %vm643_vm3, %vm644_vm2  ;;  %vm653_vm7 = vweird.f32 %v636_v48 }
 0x78d   :  { %v639_v50 = vmul.f32 %v1654_v46, %v638_v49 }
 0x78f   :  { %v640_v51 = vmul.f32 0.5, %v639_v50 }
 0x791   :  { %v641_v52 = vsub.f32 1.5, %v640_v51 }
 0x792   :  { %v1656_v53 = vpop.eup %1655 }
 0x793   :  { %v642_v54 = vmul.f32 %v1654_v46, %v641_v52  ;;  %v648_v55 = vmul.f32 %v1656_v53, %v636_v48  ;;  %vm654_vm6 = vweird.f32 %v1656_v53 }
 0x794   :  { %vm655_vm8 = vmor %vm653_vm7, %vm654_vm6 }
 0x795   :  { %v646_v57 = vsel %vm645_vm5, %v1654_v46, %v642_v54  ;;  %v649_v58 = vmul.f32 %v1656_v53, %v648_v55 }
 0x796   :  { %v657_v59 = vmul.f32 %v646_v57, %v623_v32 }
 0x797   :  { %v650_v61 = vmul.f32 0.5, %v649_v58 }
 0x798   :  { %v662_v62 = vmul.f32 %v1617_v56, %v657_v59  ;;  %v1542_v59 = vld [vmem:[%s2278_s7 + $0x38] sm:$0xff] }
 0x799   :  { %v651_v63 = vsub.f32 1.5, %v650_v61  ;;  %852 = vmatpush.msrb.mxu2 %v1542_v59  ;;  %v1540_v61 = vld [vmem:[%s2278_s7 + $0x28] sm:$0xff] }
 0x79a   :  { %v667_v0 = vadd.f32 %v1618_v60, %v662_v62  ;;  %v1539_v62 = vld [vmem:[%s2278_s7 + $0x20] sm:$0xff] }
 0x79b   :  { %v652_v1 = vmul.f32 %v1656_v53, %v651_v63 }
 0x79c   :  { %1535 = vmatmul.msk.f32.vlgmr.msra.gmra.mxu1 %vm131_vm4, %v667_v0 }
 0x79d   :  { %v656_v2 = vsel %vm655_vm8, %v1656_v53, %v652_v1 }
 0x79e   :  { %v658_v3 = vmul.f32 %v656_v2, %v624_v36 }
 0x7a0   :  { %v663_v4 = vmul.f32 %v1617_v56, %v658_v3 }
 0x7a2   :  { %v668_v5 = vadd.f32 %v1618_v60, %v663_v4  ;;  %v1541_v60 = vld [vmem:[%s2278_s7 + $0x30] sm:$0xff] }
 0x7a3   :  { %853 = vmatpush.msrb.mxu2 %v1541_v60 }
 0x7a4   :  { %1536 = vmatmul.msk.f32.gmra.mxu1 %vm131_vm4, %v668_v5 }
 0x7a5   :  { %854 = vmatpush.msrb.mxu2 %v1540_v61 }
 0x7a7   :  { %855 = vmatpush.msrb.mxu2 %v1539_v62 }
 0x819   :  { %v700_v16 = vpop.f32.mrf.mxu1 }
 0x81a   :  { %v701_v18 = vadd.f32 %v1619_v15, %v700_v16 }
 0x81c   :  { %v706_v19 = vmul.f32 %v701_v18, %v701_v18 }
 0x81e   :  { %v708_v20 = vmul.f32 %v706_v19, %v701_v18  ;;  %v1622_v19 = vld [vmem:[%s2289_s18] ss:$0 sm:$0xff] }
 0x820   :  { %v710_v21 = vmul.f32 0.044715, %v708_v20 }
 0x821   :  { %v703_v23 = vpop.f32.mrf.mxu1 }
 0x822   :  { %v712_v24 = vadd.f32 %v710_v21, %v701_v18  ;;  %v704_v26 = vadd.f32 %v1619_v15, %v703_v23 }
 0x824   :  { %v714_v27 = vmul.f32 0.7978846, %v712_v24  ;;  %v707_v28 = vmul.f32 %v704_v26, %v704_v26 }
 0x826   :  { %1657 = vtanh.f32 %v714_v27  ;;  %v709_v29 = vmul.f32 %v707_v28, %v704_v26 }
 0x828   :  { %v711_v31 = vmul.f32 0.044715, %v709_v29 }
 0x82a   :  { %v713_v32 = vadd.f32 %v711_v31, %v704_v26 }
 0x82c   :  { %v1658_v33 = vpop.eup %1657  ;;  %v715_v34 = vmul.f32 0.7978846, %v713_v32  ;;  %v1623_v32 = vld [vmem:[%s2279_s8 + $0x1] ss:$0 sm:$0xff] }
 0x82d   :  { %v718_v35 = vadd.f32 1.0, %v1658_v33 }
 0x82e   :  { %1659 = vtanh.f32 %v715_v34 }
 0x82f   :  { %v720_v12 = vmul.f32 0.5, %v718_v35 }
 0x831   :  { %v722_v36 = vmul.f32 %v720_v12, %v701_v18 }
 0x833   :  { %1537 = vmatmul.msk.f32.vlgmr.msrb.gmra.mxu0 %vm736_vm9, %v722_v36 }
 0x834   :  { %v1660_v37 = vpop.eup %1659 }
 0x835   :  { %v719_v38 = vadd.f32 1.0, %v1660_v37 }
 0x837   :  { %v721_v17 = vmul.f32 0.5, %v719_v38 }
 0x839   :  { %v723_v40 = vmul.f32 %v721_v17, %v704_v26 }
 0x83b   :  { %1538 = vmatmul.msk.f32.gmra.mxu0 %vm736_vm9, %v723_v40 }
 0x8b0   :  { %v760_v41 = vpop.f32.mrf.mxu0 }
 0x8b1   :  { %v761_v42 = vadd.f32 %v1620_v25, %v760_v41 }
 0x8b3   :  { %v766_v22 = vadd.f32 %v761_v42, %v667_v0 }
 0x8b5   :  { %v770_v43 = vsel %vm131_vm4, %v766_v22, 0.0 }
 0x8b6   :  { %771 = vadd.xlane.f32.xlu0 %v770_v43 }
 0x8b8   :  { %v763_v44 = vpop.f32.mrf.mxu0 }
 0x8b9   :  { %v764_v45 = vadd.f32 %v1620_v25, %v763_v44 }
 0x8bb   :  { %v767_v46 = vadd.f32 %v764_v45, %v668_v5 }
 0x8bd   :  { %v773_v48 = vsel %vm131_vm4, %v767_v46, 0.0 }
 0x8be   :  { %774 = vadd.xlane.f32.xlu2 %v773_v48 }
 0x929   :  { %v772_v49 = vpop.xlane.xlu0 %771 }
 0x92a   :  { %v776_v50 = vmul.f32 %v772_v49, %v1883_v39 }
 0x92c   :  { %v778_v51 = vsub.f32 %v766_v22, %v776_v50 }
 0x92e   :  { %v780_v52 = vmul.f32 %v778_v51, %v778_v51 }
 0x930   :  { %v782_v53 = vsel %vm131_vm4, %v780_v52, 0.0 }
 0x931   :  { %v775_v54 = vpop.xlane.xlu2 %774  ;;  %783 = vadd.xlane.f32.xlu1 %v782_v53 }
 0x932   :  { %v777_v55 = vmul.f32 %v775_v54, %v1883_v39 }
 0x934   :  { %v779_v56 = vsub.f32 %v767_v46, %v777_v55 }
 0x936   :  { %v781_v57 = vmul.f32 %v779_v56, %v779_v56 }
 0x938   :  { %v785_v58 = vsel %vm131_vm4, %v781_v57, 0.0 }
 0x939   :  { %786 = vadd.xlane.f32.xlu0 %v785_v58 }
 0x9a4   :  { %v784_v63 = vpop.xlane.xlu1 %783 }
 0x9a5   :  { %v788_v0 = vmul.f32 %v784_v63, %v1883_v39 }
 0x9a7   :  { %v790_v1 = vadd.f32 1e-12, %v788_v0 }
 0x9a9   :  { %1661 = vrsqrt.f32 %v790_v1  ;;  %vm798_vm11 = vweird.f32 %v790_v1 }
 0x9ac   :  { %v787_v2 = vpop.xlane.xlu0 %786 }
 0x9ad   :  { %v789_v3 = vmul.f32 %v787_v2, %v1883_v39 }
 0x9af   :  { %v1662_v4 = vpop.eup %1661  ;;  %v791_v5 = vadd.f32 1e-12, %v789_v3 }
 0x9b0   :  { %v793_v6 = vmul.f32 %v1662_v4, %v790_v1  ;;  %vm799_vm10 = vweird.f32 %v1662_v4 }
 0x9b1   :  { %1663 = vrsqrt.f32 %v791_v5  ;;  %vm800_vm14 = vmor %vm798_vm11, %vm799_vm10  ;;  %vm808_vm0 = vweird.f32 %v791_v5 }
 0x9b2   :  { %v794_v7 = vmul.f32 %v1662_v4, %v793_v6 }
 0x9b4   :  { %v795_v8 = vmul.f32 0.5, %v794_v7 }
 0x9b6   :  { %v796_v9 = vsub.f32 1.5, %v795_v8 }
 0x9b7   :  { %v1664_v10 = vpop.eup %1663 }
 0x9b8   :  { %v797_v11 = vmul.f32 %v1662_v4, %v796_v9  ;;  %v803_v13 = vmul.f32 %v1664_v10, %v791_v5  ;;  %vm809_vm15 = vweird.f32 %v1664_v10 }
 0x9b9   :  { %vm810_vm2 = vmor %vm808_vm0, %vm809_vm15 }
 0x9ba   :  { %v801_v15 = vsel %vm800_vm14, %v1662_v4, %v797_v11  ;;  %v804_v16 = vmul.f32 %v1664_v10, %v803_v13 }
 0x9bb   :  { %v812_v18 = vmul.f32 %v801_v15, %v778_v51 }
 0x9bc   :  { %v805_v20 = vmul.f32 0.5, %v804_v16 }
 0x9bd   :  { %v817_v21 = vmul.f32 %v1621_v14, %v812_v18 }
 0x9be   :  { %v806_v23 = vsub.f32 1.5, %v805_v20 }
 0x9bf   :  { %v2100_v24 = vadd.f32 %v1622_v19, %v817_v21 }
 0x9c0   :  { %v807_v26 = vmul.f32 %v1664_v10, %v806_v23 }
 0x9c1   :  { %1544 = vmatmul.msk.f32.vlgmr.msrb.gmra.mxu2 %vm131_vm4, %v2100_v24 }
 0x9c2   :  { %v811_v27 = vsel %vm810_vm2, %v1664_v10, %v807_v26 }
 0x9c3   :  { %v813_v28 = vmul.f32 %v811_v27, %v779_v56 }
 0x9c5   :  { %v818_v29 = vmul.f32 %v1621_v14, %v813_v28 }
 0x9c7   :  { %v2104_v31 = vadd.f32 %v1622_v19, %v818_v29 }
 0x9c9   :  { %1545 = vmatmul.msk.f32.gmra.mxu2 %vm131_vm4, %v2104_v31 }
 0xa44   :  { %v857_v33 = vpop.f32.mrf.mxu2 }
 0xa45   :  { %v2111_v34 = vadd.f32 %v1623_v32, %v857_v33 }
 0xa47   :  { %869 = vrot.lane.b32.xlu0 %v2111_v34, %s1725_s21  ;;  %864 = vrot.lane.b32.xlu1 %v2111_v34, %s1724_s30 }
 0xa4c   :  { %v860_v35 = vpop.f32.mrf.mxu2 }
 0xa4d   :  { %v2117_v12 = vadd.f32 %v1623_v32, %v860_v35 }
 0xa4f   :  { %921 = vrot.lane.b32.xlu1 %v2117_v12, %s1725_s21  ;;  %867 = vrot.lane.b32.xlu2 %v2117_v12, %s1724_s30  ;;  %v1607_v16 = vpack.i.bf16 %v2117_v12, %v2111_v34 }
 0xaa9   :  { %v868_v36 = vpop.permute.xlu2 %867 }
 0xaaa   :  { %947 = vrot.lane.b32.xlu2 %v868_v36, %s1725_s21 }
 0xab9   :  { %v865_v37 = vpop.permute.xlu1 %864  ;;  %v870_v38 = vpop.permute.xlu0 %869 }
 0xaba   :  { %895 = vrot.lane.b32.xlu0 %v865_v37, %s1725_s21  ;;  %1546 = vmatpush.xpose.msk.msrb.mxu3 %vm245_vm12, %v870_v38  ;;  %v1602_v57 = vpack.i.bf16 %v868_v36, %v865_v37 }
 0xabd   :  { %1547 = vmatmul.msk.f32.vlgmr.msrb.gmra.mxu3 %vm245_vm12, %v2111_v34 }
 0xac1   :  { %v922_v17 = vpop.permute.xlu1 %921 }
 0xac2   :  { %1550 = vmatpush.xpose.msk.msra.mxu2 %vm245_vm12, %v922_v17 }
 0xac5   :  { %1551 = vmatmul.msk.f32.vlgmr.msra.gmra.mxu2 %vm245_vm12, %v2117_v12 }
 0xb04   :  { %v948_v40 = vpop.permute.xlu2 %947 }
 0xb05   :  { %1552 = vmatpush.xpose.msk.msra.mxu3 %vm245_vm12, %v948_v40 }
 0xb08   :  { %1553 = vmatmul.msk.f32.vlgmr.msra.gmra.mxu3 %vm245_vm12, %v868_v36 }
 0xb2c   :  { %v896_v25 = vpop.permute.xlu0 %895 }
 0xb2d   :  { %1548 = vmatpush.xpose.msk.msrb.mxu1 %vm245_vm12, %v896_v25 }
 0xb30   :  { %1549 = vmatmul.msk.f32.vlgmr.msrb.gmra.mxu1 %vm245_vm12, %v865_v37 }
 0xb40   :  { %v892_v41 = vpop.f32.mrf.mxu3 }
 0xb41   :  { %v973_v42 = vmul.f32 0.25, %v892_v41 }
 0xb43   :  { %v977_v22 = vadd.f32 %v973_v42, %v1943_v30 }
 0xb45   :  { %v981_v43 = vsel %vm358_vm13, %v977_v22, -inf }
 0xb46   :  { %982 = vmax.xlane.f32.xlu1 %v981_v43 }
 0xb48   :  { %v944_v51 = vpop.f32.mrf.mxu2 }
 0xb49   :  { %v975_v53 = vmul.f32 0.25, %v944_v51 }
 0xb4b   :  { %v979_v55 = vadd.f32 %v975_v53, %v1957_v47 }
 0xb4d   :  { %v987_v56 = vsel %vm358_vm13, %v979_v55, -inf }
 0xb8b   :  { %v970_v44 = vpop.f32.mrf.mxu3 }
 0xb8c   :  { %v976_v45 = vmul.f32 0.25, %v970_v44 }
 0xb8e   :  { %v980_v46 = vadd.f32 %v976_v45, %v1957_v47 }
 0xb90   :  { %v990_v48 = vsel %vm358_vm13, %v980_v46, -inf }
 0xb91   :  { %991 = vmax.xlane.f32.xlu0 %v990_v48 }
 0xbad   :  { %v918_v49 = vpop.f32.mrf.mxu1 }
 0xbae   :  { %v974_v50 = vmul.f32 0.25, %v918_v49 }
 0xbb0   :  { %v978_v52 = vadd.f32 %v974_v50, %v1943_v30 }
 0xbb2   :  { %v984_v54 = vsel %vm358_vm13, %v978_v52, -inf }
 0xbb3   :  { %985 = vmax.xlane.f32.xlu2 %v984_v54 }
 0xbb9   :  { %v983_v30 = vpop.xlane.xlu1 %982 }
 0xbba   :  { %v993_v1 = vsub.f32 %v977_v22, %v983_v30 }
 0xbbb   :  { %988 = vmax.xlane.f32.xlu2 %v987_v56 }
 0xbbc   :  { %v997_v47 = vmul.f32 1.442695, %v993_v1 }
 0xbd3   :  { %1603 = vrot.lane.b32.xlu2 %v1602_v57, %s1726_s4 }
 0xc04   :  { %v992_v58 = vpop.xlane.xlu0 %991 }
 0xc05   :  { %v996_v59 = vsub.f32 %v980_v46, %v992_v58 }
 0xc07   :  { %v1003_v60 = vmul.f32 1.442695, %v996_v59 }
 0xc09   :  { %1665 = vpow2.f32 %v1003_v60 }
 0xc0f   :  { %v1666_v61 = vpop.eup %1665 }
 0xc10   :  { %v1014_v62 = vsel %vm358_vm13, %v1666_v61, 0.0 }
 0xc11   :  { %1015 = vadd.xlane.f32.xlu1 %v1014_v62 }
 0xc26   :  { %v986_v63 = vpop.xlane.xlu2 %985 }
 0xc27   :  { %v994_v0 = vsub.f32 %v978_v52, %v986_v63 }
 0xc29   :  { %v999_v2 = vmul.f32 1.442695, %v994_v0 }
 0xc2b   :  { %1667 = vpow2.f32 %v999_v2 }
 0xc2c   :  { %1669 = vpow2.f32 %v997_v47 }
 0xc2e   :  { %v989_v3 = vpop.xlane.xlu2 %988 }
 0xc2f   :  { %v995_v4 = vsub.f32 %v979_v55, %v989_v3 }
 0xc31   :  { %v1668_v5 = vpop.eup %1667  ;;  %v1001_v6 = vmul.f32 1.442695, %v995_v4 }
 0xc32   :  { %v1008_v7 = vsel %vm358_vm13, %v1668_v5, 0.0  ;;  %v2146_v9 = vpop.eup %1669 }
 0xc33   :  { %1671 = vpow2.f32 %v1001_v6  ;;  %1009 = vadd.xlane.f32.xlu0 %v1008_v7  ;;  %v1005_v14 = vsel %vm358_vm13, %v2146_v9, 0.0 }
 0xc36   :  { %v1604_v8 = vpop.permute.xlu2 %1603 }
 0xc37   :  { %v1606_v10 = vunpack.i.h.bf16 %v1604_v8  ;;  %v1605_v11 = vunpack.i.l.bf16 %v1604_v8 }
 0xc39   :  { %v2148_v13 = vpop.eup %1671  ;;  %1124 = vmatpush.msra.mxu0 %v1605_v11  ;;  %1176 = vmatpush.msrb.mxu3 %v1606_v10  ;;  %v1561_v11 = vld [vmem:[%s2280_s9 + $0x38] sm:$0xff] }
 0xc3a   :  { %v1011_v15 = vsel %vm358_vm13, %v2148_v13, 0.0 }
 0xc3b   :  { %1006 = vadd.xlane.f32.xlu0 %v1005_v14  ;;  %1012 = vadd.xlane.f32.xlu1 %v1011_v15  ;;  %v1559_v14 = vld [vmem:[%s2280_s9 + $0x28] sm:$0xff]  ;;  %v1558_v15 = vld [vmem:[%s2280_s9 + $0x20] sm:$0xff] }
 0xc4f   :  { %1608 = vrot.lane.b32.xlu0 %v1607_v16, %s1726_s4 }
 0xc84   :  { %v1016_v18 = vpop.xlane.xlu1 %1015 }
 0xc85   :  { %1673 = vrcp.f32 %v1016_v18  ;;  %v1073_v23 = vand.u32 2147483648, %v1016_v18  ;;  %v1071_v27 = vand.u32 2147483647, %v1016_v18  ;;  %vm1067_vm5 = vweird.f32 %v1016_v18 }
 0xc87   :  { %v1074_v29 = vor.u32 1.1754944e-38, %v1073_v23  ;;  %vm1072_vm7 = vcmp.eq.f32.partialorder %v1071_v27, 8.507059e+37 }
 0xc8b   :  { %v1674_v19 = vpop.eup %1673 }
 0xc8c   :  { %v1063_v20 = vmul.f32 %v1674_v19, %v1016_v18  ;;  %vm1068_vm3 = vweird.f32 %v1674_v19 }
 0xc8d   :  { %vm1069_vm6 = vmor %vm1067_vm5, %vm1068_vm3 }
 0xc8e   :  { %v1064_v21 = vsub.f32 1.0, %v1063_v20  ;;  %v1624_v20 = vld [vmem:[%s2281_s10 + $0x1] ss:$0 sm:$0xff] }
 0xc90   :  { %v1065_v26 = vmul.f32 %v1674_v19, %v1064_v21 }
 0xc92   :  { %v1066_v28 = vadd.f32 %v1674_v19, %v1065_v26 }
 0xc94   :  { %v1070_v32 = vsel %vm1069_vm6, %v1674_v19, %v1066_v28 }
 0xc95   :  { %v1075_v33 = vsel %vm1072_vm7, %v1074_v29, %v1070_v32 }
 0xc96   :  { %v1076_v35 = vmul.f32 %v1666_v61, %v1075_v33 }
 0xc98   :  { %1557 = vmatmul.msk.f32.vlgmr.msrb.gmra.mxu3 %vm358_vm13, %v1076_v35 }
 0xca6   :  { %v1010_v34 = vpop.xlane.xlu0 %1009 }
 0xca7   :  { %1675 = vrcp.f32 %v1010_v34  ;;  %v1043_v40 = vand.u32 2147483648, %v1010_v34  ;;  %v1041_v41 = vand.u32 2147483647, %v1010_v34  ;;  %vm1037_vm10 = vweird.f32 %v1010_v34 }
 0xca9   :  { %v1044_v43 = vor.u32 1.1754944e-38, %v1043_v40  ;;  %vm1042_vm14 = vcmp.eq.f32.partialorder %v1041_v41, 8.507059e+37 }
 0xcad   :  { %v1676_v12 = vpop.eup %1675 }
 0xcae   :  { %v1033_v36 = vmul.f32 %v1676_v12, %v1010_v34  ;;  %v1013_v37 = vpop.xlane.xlu1 %1012  ;;  %v1007_v38 = vpop.xlane.xlu0 %1006  ;;  %vm1038_vm8 = vweird.f32 %v1676_v12 }
 0xcaf   :  { %1677 = vrcp.f32 %v1013_v37  ;;  %vm1039_vm11 = vmor %vm1037_vm10, %vm1038_vm8  ;;  %v1058_v54 = vand.u32 2147483648, %v1013_v37  ;;  %v1028_v55 = vand.u32 2147483648, %v1007_v38  ;;  %v1056_v56 = vand.u32 2147483647, %v1013_v37 }
 0xcb0   :  { %v1034_v17 = vsub.f32 1.0, %v1033_v36  ;;  %1679 = vrcp.f32 %v1007_v38  ;;  %v1026_v58 = vand.u32 2147483647, %v1007_v38  ;;  %vm1052_vm2 = vweird.f32 %v1013_v37 }
 0xcb1   :  { %vm1022_vm5 = vweird.f32 %v1007_v38  ;;  %v1059_v62 = vor.u32 1.1754944e-38, %v1058_v54  ;;  %v1029_v30 = vor.u32 1.1754944e-38, %v1028_v55  ;;  %vm1057_vm7 = vcmp.eq.f32.partialorder %v1056_v56, 8.507059e+37 }
 0xcb2   :  { %v1035_v25 = vmul.f32 %v1676_v12, %v1034_v17  ;;  %vm1027_vm8 = vcmp.eq.f32.partialorder %v1026_v58, 8.507059e+37 }
 0xcb4   :  { %v1036_v42 = vadd.f32 %v1676_v12, %v1035_v25 }
 0xcb5   :  { %v1678_v22 = vpop.eup %1677 }
 0xcb6   :  { %v1680_v44 = vpop.eup %1679  ;;  %v1040_v45 = vsel %vm1039_vm11, %v1676_v12, %v1036_v42  ;;  %v1048_v46 = vmul.f32 %v1678_v22, %v1013_v37  ;;  %vm1053_vm15 = vweird.f32 %v1678_v22  ;;  %v1570_v42 = vld [vmem:[%s2284_s13 + $0x38] sm:$0xff] }
 0xcb7   :  { %v1045_v48 = vsel %vm1042_vm14, %v1044_v43, %v1040_v45  ;;  %v1018_v49 = vmul.f32 %v1680_v44, %v1007_v38  ;;  %vm1023_vm0 = vweird.f32 %v1680_v44  ;;  %vm1054_vm3 = vmor %vm1052_vm2, %vm1053_vm15  ;;  %1322 = vmatpush.msrb.mxu0 %v1570_v42  ;;  %v1568_v43 = vld [vmem:[%s2284_s13 + $0x28] sm:$0xff] }
 0xcb8   :  { %v1049_v50 = vsub.f32 1.0, %v1048_v46  ;;  %v1046_v51 = vmul.f32 %v1668_v5, %v1045_v48  ;;  %vm1024_vm6 = vmor %vm1022_vm5, %vm1023_vm0 }
 0xcb9   :  { %v1019_v52 = vsub.f32 1.0, %v1018_v49 }
 0xcba   :  { %v1050_v53 = vmul.f32 %v1678_v22, %v1049_v50  ;;  %1555 = vmatmul.msk.f32.vlgmr.msra.gmra.mxu0 %vm358_vm13, %v1046_v51 }
 0xcbb   :  { %v1020_v57 = vmul.f32 %v1680_v44, %v1019_v52 }
 0xcbc   :  { %v1051_v59 = vadd.f32 %v1678_v22, %v1050_v53 }
 0xcbd   :  { %v1021_v60 = vadd.f32 %v1680_v44, %v1020_v57 }
 0xcbe   :  { %v1055_v61 = vsel %vm1054_vm3, %v1678_v22, %v1051_v59  ;;  %v1569_v22 = vld [vmem:[%s2284_s13 + $0x30] sm:$0xff] }
 0xcbf   :  { %v1025_v63 = vsel %vm1024_vm6, %v1680_v44, %v1021_v60  ;;  %v1060_v0 = vsel %vm1057_vm7, %v1059_v62, %v1055_v61  ;;  %1323 = vmatpush.msrb.mxu0 %v1569_v22  ;;  %v1567_v44 = vld [vmem:[%s2284_s13 + $0x20] sm:$0xff]  ;;  %vm1479_vm7 = vcmask 253952  }
 0xcc0   :  { %v1030_v1 = vsel %vm1027_vm8, %v1029_v30, %v1025_v63  ;;  %v1061_v5 = vmul.f32 %v2148_v13, %v1060_v0  ;;  %v1560_v13 = vld [vmem:[%s2280_s9 + $0x30] sm:$0xff]  ;;  %v1625_v60 = vld [vmem:[%s2282_s11 + $0x1] ss:$0 sm:$0xff] }
 0xcc1   :  { %v1609_v2 = vpop.permute.xlu0 %1608  ;;  %v1031_v4 = vmul.f32 %v2146_v9, %v1030_v1  ;;  %1324 = vmatpush.msrb.mxu0 %v1568_v43  ;;  %v1626_v63 = vld [vmem:[%s2283_s12 + $0x1] ss:$0 sm:$0xff] }
 0xcc2   :  { %v1611_v47 = vunpack.i.h.bf16 %v1609_v2  ;;  %v1610_v3 = vunpack.i.l.bf16 %v1609_v2  ;;  %v1628_v43 = vld [vmem:[%s2287_s16 + $0x1] ss:$0 sm:$0xff] }
 0xcc3   :  { %1325 = vmatpush.msrb.mxu0 %v1567_v44 }
 0xcc4   :  { %1098 = vmatpush.msra.mxu1 %v1610_v3  ;;  %1150 = vmatpush.msrb.mxu2 %v1611_v47 }
 0xcc5   :  { %1554 = vmatmul.msk.f32.vlgmr.msra.gmra.mxu1 %vm358_vm13, %v1031_v4  ;;  %1556 = vmatmul.msk.f32.vlgmr.msrb.gmra.mxu2 %vm358_vm13, %v1061_v5 }
 0xcc6   :  { %1223 = vmatpush.msrb.mxu1 %v1561_v11  ;;  %v1578_v11 = vld [vmem:[%s2286_s15 + $0x60] sm:$0xff] }
 0xcc8   :  { %1224 = vmatpush.msrb.mxu1 %v1560_v13  ;;  %v1577_v13 = vld [vmem:[%s2286_s15 + $0x58] sm:$0xff] }
 0xcca   :  { %1225 = vmatpush.msrb.mxu1 %v1559_v14  ;;  %v1576_v14 = vld [vmem:[%s2286_s15 + $0x50] sm:$0xff] }
 0xccc   :  { %1226 = vmatpush.msrb.mxu1 %v1558_v15  ;;  %v1575_v15 = vld [vmem:[%s2286_s15 + $0x48] sm:$0xff] }
 0xd1b   :  { %v1178_v6 = vpop.f32.mrf.mxu3 }
 0xd1c   :  { %1189 = vrot.lane.b32.xlu2 %v1178_v6, %s1727_s14 }
 0xd37   :  { %v1126_v7 = vpop.f32.mrf.mxu0 }
 0xd38   :  { %1183 = vrot.lane.b32.xlu1 %v1126_v7, %s1727_s14 }
 0xd42   :  { %v1100_v8 = vpop.f32.mrf.mxu1 }
 0xd43   :  { %1181 = vst.msk [vmem:[#allocation2] sm:$0xff] %vm245_vm12, %v1100_v8  ;;  %v1581_v8 = vld [vmem:[%s2286_s15 + $0x78] sm:$0xff] }
 0xd44   :  { %1379 = vmatpush.msra.mxu2 %v1581_v8 }
 0xd48   :  { %v1152_v10 = vpop.f32.mrf.mxu2 }
 0xd49   :  { %1187 = vst.msk [vmem:[#allocation2 + $0x8] sm:$0xff] %vm245_vm12, %v1152_v10  ;;  %v1580_v10 = vld [vmem:[%s2286_s15 + $0x70] sm:$0xff] }
 0xd4a   :  { %1380 = vmatpush.msra.mxu2 %v1580_v10 }
 0xd76   :  { %v1190_v9 = vpop.permute.xlu2 %1189 }
 0xd77   :  { %1192 = vst.msk [vmem:[#allocation2 + $0x8] sm:$0xff] %vm564_vm1, %v1190_v9  ;;  %v1579_v9 = vld [vmem:[%s2286_s15 + $0x68] sm:$0xff] }
 0xd78   :  { %1381 = vmatpush.msra.mxu2 %v1579_v9 }
 0xd7a   :  { %1382 = vmatpush.msra.mxu2 %v1578_v11 }
 0xd7c   :  { %1383 = vmatpush.msra.mxu2 %v1577_v13 }
 0xd7e   :  { %v1194_v19 = vld [vmem:[#allocation2 + $0x8] sm:$0xff]  ;;  %1384 = vmatpush.msra.mxu2 %v1576_v14 }
 0xd80   :  { %1385 = vmatpush.msra.mxu2 %v1575_v15 }
 0xdaa   :  { %v1184_v16 = vpop.permute.xlu1 %1183 }
 0xdab   :  { %1186 = vst.msk [vmem:[#allocation2] sm:$0xff] %vm564_vm1, %v1184_v16  ;;  %v1574_v16 = vld [vmem:[%s2286_s15 + $0x40] sm:$0xff] }
 0xdac   :  { %1386 = vmatpush.msra.mxu2 %v1574_v16 }
 0xdb2   :  { %v1193_v18 = vld [vmem:[#allocation2] sm:$0xff] }
 0xdb3   :  { %1563 = vmatmul.msk.f32.vlgmr.msrb.gmra.mxu1 %vm131_vm4, %v1193_v18  ;;  %v1627_v18 = vld [vmem:[%s2303_s5 + $0x1] ss:$0 sm:$0xff] }
 0xdbb   :  { %1564 = vmatmul.msk.f32.gmra.mxu1 %vm131_vm4, %v1194_v19 }
 0xe30   :  { %v1228_v21 = vpop.f32.mrf.mxu1 }
 0xe31   :  { %v1229_v23 = vadd.f32 %v1624_v20, %v1228_v21 }
 0xe33   :  { %v1234_v26 = vadd.f32 %v1229_v23, %v2100_v24 }
 0xe35   :  { %v1240_v27 = vsel %vm131_vm4, %v1234_v26, 0.0 }
 0xe36   :  { %1241 = vadd.xlane.f32.xlu0 %v1240_v27 }
 0xe38   :  { %v1231_v28 = vpop.f32.mrf.mxu1 }
 0xe39   :  { %v1232_v29 = vadd.f32 %v1624_v20, %v1231_v28 }
 0xe3b   :  { %v1235_v32 = vadd.f32 %v1232_v29, %v2104_v31 }
 0xe3d   :  { %v1243_v33 = vsel %vm131_vm4, %v1235_v32, 0.0 }
 0xe3e   :  { %1244 = vadd.xlane.f32.xlu2 %v1243_v33 }
 0xea9   :  { %v1242_v35 = vpop.xlane.xlu0 %1241 }
 0xeaa   :  { %v1246_v34 = vmul.f32 %v1242_v35, %v1883_v39 }
 0xeac   :  { %v1248_v12 = vsub.f32 %v1234_v26, %v1246_v34 }
 0xeae   :  { %v1250_v36 = vmul.f32 %v1248_v12, %v1248_v12 }
 0xeb0   :  { %v1252_v37 = vsel %vm131_vm4, %v1250_v36, 0.0 }
 0xeb1   :  { %v1245_v38 = vpop.xlane.xlu2 %1244  ;;  %1253 = vadd.xlane.f32.xlu1 %v1252_v37 }
 0xeb2   :  { %v1247_v17 = vmul.f32 %v1245_v38, %v1883_v39 }
 0xeb4   :  { %v1249_v40 = vsub.f32 %v1235_v32, %v1247_v17 }
 0xeb6   :  { %v1251_v25 = vmul.f32 %v1249_v40, %v1249_v40 }
 0xeb8   :  { %v1255_v41 = vsel %vm131_vm4, %v1251_v25, 0.0 }
 0xeb9   :  { %1256 = vadd.xlane.f32.xlu0 %v1255_v41 }
 0xf24   :  { %v1254_v45 = vpop.xlane.xlu1 %1253 }
 0xf25   :  { %v1258_v46 = vmul.f32 %v1254_v45, %v1883_v39 }
 0xf27   :  { %v1260_v48 = vadd.f32 1e-12, %v1258_v46 }
 0xf29   :  { %1681 = vrsqrt.f32 %v1260_v48  ;;  %vm1268_vm13 = vweird.f32 %v1260_v48 }
 0xf2c   :  { %v1257_v49 = vpop.xlane.xlu0 %1256 }
 0xf2d   :  { %v1259_v50 = vmul.f32 %v1257_v49, %v1883_v39 }
 0xf2f   :  { %v1682_v51 = vpop.eup %1681  ;;  %v1261_v52 = vadd.f32 1e-12, %v1259_v50 }
 0xf30   :  { %v1263_v53 = vmul.f32 %v1682_v51, %v1260_v48  ;;  %vm1269_vm12 = vweird.f32 %v1682_v51 }
 0xf31   :  { %1683 = vrsqrt.f32 %v1261_v52  ;;  %vm1270_vm1 = vmor %vm1268_vm13, %vm1269_vm12  ;;  %vm1278_vm11 = vweird.f32 %v1261_v52 }
 0xf32   :  { %v1264_v54 = vmul.f32 %v1682_v51, %v1263_v53 }
 0xf34   :  { %v1265_v55 = vmul.f32 0.5, %v1264_v54 }
 0xf36   :  { %v1266_v56 = vsub.f32 1.5, %v1265_v55 }
 0xf37   :  { %v1684_v57 = vpop.eup %1683 }
 0xf38   :  { %v1267_v58 = vmul.f32 %v1682_v51, %v1266_v56  ;;  %v1273_v59 = vmul.f32 %v1684_v57, %v1261_v52  ;;  %vm1279_vm10 = vweird.f32 %v1684_v57 }
 0xf39   :  { %vm1280_vm14 = vmor %vm1278_vm11, %vm1279_vm10 }
 0xf3a   :  { %v1271_v61 = vsel %vm1270_vm1, %v1682_v51, %v1267_v58  ;;  %v1274_v62 = vmul.f32 %v1684_v57, %v1273_v59 }
 0xf3b   :  { %v1282_v30 = vmul.f32 %v1271_v61, %v1248_v12 }
 0xf3c   :  { %v1275_v0 = vmul.f32 0.5, %v1274_v62 }
 0xf3d   :  { %v1287_v1 = vmul.f32 %v1625_v60, %v1282_v30 }
 0xf3e   :  { %v1276_v2 = vsub.f32 1.5, %v1275_v0 }
 0xf3f   :  { %v1292_v47 = vadd.f32 %v1626_v63, %v1287_v1 }
 0xf40   :  { %v1277_v3 = vmul.f32 %v1684_v57, %v1276_v2 }
 0xf41   :  { %1572 = vmatmul.msk.f32.vlgmr.msrb.gmra.mxu0 %vm131_vm4, %v1292_v47 }
 0xf42   :  { %v1281_v4 = vsel %vm1280_vm14, %v1684_v57, %v1277_v3 }
 0xf43   :  { %v1283_v5 = vmul.f32 %v1281_v4, %v1249_v40 }
 0xf45   :  { %v1288_v6 = vmul.f32 %v1625_v60, %v1283_v5 }
 0xf47   :  { %v1293_v7 = vadd.f32 %v1626_v63, %v1288_v6  ;;  %v1728_v6 = vmov 8.0  }
 0xf49   :  { %1573 = vmatmul.msk.f32.gmra.mxu0 %vm131_vm4, %v1293_v7 }
 0xfbe   :  { %v1327_v19 = vpop.f32.mrf.mxu0 }
 0xfbf   :  { %v1328_v20 = vadd.f32 %v1627_v18, %v1327_v19 }
 0xfc1   :  { %v1333_v21 = vmul.f32 %v1328_v20, %v1328_v20 }
 0xfc3   :  { %v1335_v23 = vmul.f32 %v1333_v21, %v1328_v20 }
 0xfc5   :  { %v1337_v26 = vmul.f32 0.044715, %v1335_v23 }
 0xfc6   :  { %v1330_v27 = vpop.f32.mrf.mxu0 }
 0xfc7   :  { %v1339_v28 = vadd.f32 %v1337_v26, %v1328_v20  ;;  %v1331_v29 = vadd.f32 %v1627_v18, %v1330_v27 }
 0xfc9   :  { %v1341_v32 = vmul.f32 0.7978846, %v1339_v28  ;;  %v1334_v33 = vmul.f32 %v1331_v29, %v1331_v29 }
 0xfcb   :  { %1685 = vtanh.f32 %v1341_v32  ;;  %v1336_v35 = vmul.f32 %v1334_v33, %v1331_v29 }
 0xfcd   :  { %v1338_v34 = vmul.f32 0.044715, %v1336_v35 }
 0xfcf   :  { %v1340_v12 = vadd.f32 %v1338_v34, %v1331_v29 }
 0xfd1   :  { %v1686_v36 = vpop.eup %1685  ;;  %v1342_v37 = vmul.f32 0.7978846, %v1340_v12 }
 0xfd2   :  { %v1345_v38 = vadd.f32 1.0, %v1686_v36 }
 0xfd3   :  { %1687 = vtanh.f32 %v1342_v37 }
 0xfd4   :  { %v1347_v17 = vmul.f32 0.5, %v1345_v38 }
 0xfd6   :  { %v1349_v40 = vmul.f32 %v1347_v17, %v1328_v20  ;;  %v1630_v20 = vld [vmem:[%s2289_s18 + $0x1] ss:$0 sm:$0xff] }
 0xfd8   :  { %1583 = vmatmul.msk.f32.vlgmr.msra.gmra.mxu2 %vm736_vm9, %v1349_v40 }
 0xfd9   :  { %v1688_v25 = vpop.eup %1687 }
 0xfda   :  { %v1346_v41 = vadd.f32 1.0, %v1688_v25 }
 0xfdc   :  { %v1348_v42 = vmul.f32 0.5, %v1346_v41 }
 0xfde   :  { %v1350_v22 = vmul.f32 %v1348_v42, %v1331_v29 }
 0xfe0   :  { %1584 = vmatmul.msk.f32.gmra.mxu2 %vm736_vm9, %v1350_v22 }
0x105b   :  { %v1388_v44 = vpop.f32.mrf.mxu2 }
0x105c   :  { %v1389_v45 = vadd.f32 %v1628_v43, %v1388_v44 }
0x105e   :  { %v1394_v46 = vadd.f32 %v1389_v45, %v1292_v47 }
0x1060   :  { %v1400_v48 = vsel %vm131_vm4, %v1394_v46, 0.0 }
0x1061   :  { %1401 = vadd.xlane.f32.xlu2 %v1400_v48 }
0x1063   :  { %v1391_v49 = vpop.f32.mrf.mxu2 }
0x1064   :  { %v1392_v50 = vadd.f32 %v1628_v43, %v1391_v49 }
0x1066   :  { %v1395_v51 = vadd.f32 %v1392_v50, %v1293_v7  ;;  %v1454_v7 = vsel %vm131_vm4, %v2100_v24, 0.0  ;;  %v1481_v24 = vsel %vm131_vm4, %v2104_v31, 0.0 }
0x1067   :  { %v1455_v10 = vrot.slane %v1454_v7, 4  ;;  %v1482_v28 = vrot.slane %v1481_v24, 4 }
0x1068   :  { %v1403_v52 = vsel %vm131_vm4, %v1395_v51, 0.0 }
0x1069   :  { %1404 = vadd.xlane.f32.xlu0 %v1403_v52  ;;  %v1456_v19 = vadd.f32 %v1455_v10, %v1454_v7  ;;  %v1483_v31 = vadd.f32 %v1482_v28, %v1481_v24 }
0x106b   :  { %v1457_v32 = vrot.slane %v1456_v19, 2  ;;  %v1484_v42 = vrot.slane %v1483_v31, 2 }
0x106d   :  { %v1458_v38 = vadd.f32 %v1457_v32, %v1456_v19  ;;  %v1485_v49 = vadd.f32 %v1484_v42, %v1483_v31 }
0x106f   :  { %v1459_v22 = vrot.slane %v1458_v38, 1 }
0x10d4   :  { %v1402_v53 = vpop.xlane.xlu2 %1401 }
0x10d5   :  { %v1406_v54 = vmul.f32 %v1402_v53, %v1883_v39 }
0x10d7   :  { %v1408_v55 = vsub.f32 %v1394_v46, %v1406_v54 }
0x10d9   :  { %v1410_v56 = vmul.f32 %v1408_v55, %v1408_v55 }
0x10db   :  { %v1412_v57 = vsel %vm131_vm4, %v1410_v56, 0.0  ;;  %v1486_v56 = vrot.slane %v1485_v49, 1 }
0x10dc   :  { %1413 = vadd.xlane.f32.xlu1 %v1412_v57  ;;  %v1405_v58 = vpop.xlane.xlu0 %1404 }
0x10dd   :  { %v1407_v59 = vmul.f32 %v1405_v58, %v1883_v39 }
0x10df   :  { %v1409_v60 = vsub.f32 %v1395_v51, %v1407_v59  ;;  %v1460_v51 = vadd.f32 %v1459_v22, %v1458_v38 }
0x10e1   :  { %v1411_v61 = vmul.f32 %v1409_v60, %v1409_v60 }
0x10e3   :  { %v1415_v62 = vsel %vm131_vm4, %v1411_v61, 0.0 }
0x10e4   :  { %1416 = vadd.xlane.f32.xlu2 %v1415_v62 }
0x114f   :  { %v1414_v30 = vpop.xlane.xlu1 %1413 }
0x1150   :  { %v1418_v63 = vmul.f32 %v1414_v30, %v1883_v39  ;;  %v1487_v30 = vadd.f32 %v1486_v56, %v1485_v49 }
0x1152   :  { %v1420_v0 = vadd.f32 1e-12, %v1418_v63 }
0x1154   :  { %1689 = vrsqrt.f32 %v1420_v0  ;;  %vm1428_vm15 = vweird.f32 %v1420_v0 }
0x1157   :  { %v1417_v1 = vpop.xlane.xlu2 %1416 }
0x1158   :  { %v1419_v2 = vmul.f32 %v1417_v1, %v1883_v39  ;;  %v1629_v39 = vld [vmem:[%s2288_s17 + $0x1] ss:$0 sm:$0xff]  ;;  %s1729_s17 = smov [#allocation3]  }
0x1159   :  { %s1505_s18 = sshll.u32 %s1729_s17, 4  ;;  %s1506_s18 = int_to_ptr.vmem [resolvable:$true] %s1505_s18 }
0x115a   :  { %v1690_v47 = vpop.eup %1689  ;;  %v1421_v3 = vadd.f32 1e-12, %v1419_v2 }
0x115b   :  { %v1423_v4 = vmul.f32 %v1690_v47, %v1420_v0  ;;  %vm1429_vm9 = vweird.f32 %v1690_v47 }
0x115c   :  { %1691 = vrsqrt.f32 %v1421_v3  ;;  %vm1430_vm0 = vmor %vm1428_vm15, %vm1429_vm9  ;;  %vm1438_vm3 = vweird.f32 %v1421_v3 }
0x115d   :  { %v1424_v5 = vmul.f32 %v1690_v47, %v1423_v4  ;;  %1693 = vrcp.f32 %v1728_v6 }
0x115f   :  { %v1425_v8 = vmul.f32 0.5, %v1424_v5 }
0x1161   :  { %v1426_v9 = vsub.f32 1.5, %v1425_v8 }
0x1162   :  { %v1692_v11 = vpop.eup %1691 }
0x1163   :  { %v1694_v13 = vpop.eup %1693  ;;  %v1427_v14 = vmul.f32 %v1690_v47, %v1426_v9  ;;  %v1433_v15 = vmul.f32 %v1692_v11, %v1421_v3  ;;  %vm1439_vm2 = vweird.f32 %v1692_v11 }
0x1164   :  { %v1462_v23 = vmul.f32 8.0, %v1694_v13  ;;  %vm1440_vm5 = vmor %vm1438_vm3, %vm1439_vm2  ;;  %vm1466_vm6 = vweird.f32 %v1694_v13 }
0x1165   :  { %v1431_v16 = vsel %vm1430_vm0, %v1690_v47, %v1427_v14  ;;  %v1434_v18 = vmul.f32 %v1692_v11, %v1433_v15 }
0x1166   :  { %v1442_v21 = vmul.f32 %v1431_v16, %v1408_v55  ;;  %v1463_v35 = vsub.f32 1.0, %v1462_v23 }
0x1167   :  { %v1435_v26 = vmul.f32 0.5, %v1434_v18 }
0x1168   :  { %v1447_v27 = vmul.f32 %v1629_v39, %v1442_v21  ;;  %v1464_v40 = vmul.f32 %v1694_v13, %v1463_v35 }
0x1169   :  { %v1436_v29 = vsub.f32 1.5, %v1435_v26 }
0x116a   :  { %v1452_v33 = vadd.f32 %v1630_v20, %v1447_v27  ;;  %v1465_v45 = vadd.f32 %v1694_v13, %v1464_v40 }
0x116b   :  { %v1437_v34 = vmul.f32 %v1692_v11, %v1436_v29 }
0x116c   :  { %v1469_v12 = vsel %vm131_vm4, %v1452_v33, 0.0  ;;  %v1467_v53 = vsel %vm1466_vm6, %v1694_v13, %v1465_v45 }
0x116d   :  { %v1470_v36 = vrot.slane %v1469_v12, 4  ;;  %v1441_v37 = vsel %vm1440_vm5, %v1692_v11, %v1437_v34  ;;  %v1468_v57 = vmul.f32 %v1467_v53, %v1460_v51  ;;  %v1488_v1 = vmul.f32 %v1487_v30, %v1467_v53 }
0x116e   :  { %v1443_v17 = vmul.f32 %v1441_v37, %v1409_v60 }
0x116f   :  { %v1471_v25 = vadd.f32 %v1470_v36, %v1469_v12 }
0x1170   :  { %v1448_v41 = vmul.f32 %v1629_v39, %v1443_v17 }
0x1171   :  { %v1472_v43 = vrot.slane %v1471_v25, 2 }
0x1172   :  { %v1453_v44 = vadd.f32 %v1630_v20, %v1448_v41 }
0x1173   :  { %v1473_v46 = vadd.f32 %v1472_v43, %v1471_v25 }
0x1174   :  { %v1489_v48 = vsel %vm131_vm4, %v1453_v44, 0.0 }
0x1175   :  { %v1490_v50 = vrot.slane %v1489_v48, 4  ;;  %v1474_v52 = vrot.slane %v1473_v46, 1 }
0x1177   :  { %v1475_v54 = vadd.f32 %v1474_v52, %v1473_v46  ;;  %v1491_v55 = vadd.f32 %v1490_v50, %v1489_v48 }
0x1179   :  { %v1476_v58 = vmul.f32 %v1475_v54, %v1467_v53  ;;  %v1492_v59 = vrot.slane %v1491_v55, 2 }
0x117b   :  { %v1477_v60 = vadd.f32 %v1476_v58, %v1468_v57  ;;  %v1493_v61 = vadd.f32 %v1492_v59, %v1491_v55 }
0x117d   :  { %v1478_v62 = vmul.f32 0.5, %v1477_v60  ;;  %v1494_v63 = vrot.slane %v1493_v61, 1 }
0x117f   :  { %1480 = vst.msk [vmem:[#allocation3] sm:$0x1] %vm1479_vm7, %v1478_v62  ;;  %v1495_v0 = vadd.f32 %v1494_v63, %v1493_v61 }
0x1181   :  { %v1496_v2 = vmul.f32 %v1495_v0, %v1467_v53 }
0x1183   :  { %v1497_v47 = vadd.f32 %v1496_v2, %v1488_v1 }
0x1185   :  { %v1498_v3 = vmul.f32 0.5, %v1497_v47 }
0x1187   :  { %1499 = vst.msk [vmem:[#allocation3 + $0x1] sm:$0x1] %vm1479_vm7, %v1498_v3 }
0x1188   :  { %1510 = dma.vmem_to_hbm [thread:$0]  %s1506_s18, 32, %s1508_s29, [#allocation4]  }
0x1189   :  { %1719 = dma.done.wait [#allocation4], 32  }
0x118a   :  { %1720 = vsyncadd [#allocation4], 4294967264 }
0x118b   :  { %1515 = vsyncpa [#allocation4], 1 }

</bundles_post_ra>
